<compile_context>
chip_gen: v5e
topology: v5e:2x2
jax: 0.10.0
libtpu: 0.0.40
codegen_flags: <defaults>
</compile_context>

<pallas_src>
import math

import jax
import jax.numpy as jnp
from jax import lax
from jax.experimental import pallas as pl
from jax.experimental.pallas import tpu as pltpu


def _make_gcn_kernel(has_t: bool, has_f: bool, n_stu: int,
                     out_true: int, out_pad: int):
    """Build the fused kernel for one of the three forward branches."""
    inv_sqrt = 1.0 / math.sqrt(out_true)
    inv_n_stu = 1.0 / float(n_stu)
    inv_ln2 = 1.0 / math.log(2.0)
    need_mask = out_pad != out_true
    # adj.T @ x as one MXU transposed contraction: contract adj dim 0 (rows)
    # with x dim 0.  No transposed adjacency copy anywhere.
    trans_dims = (((0,), (0,)), ((), ()))

    def lin(x, wt_ref, b_ref):
        # nn.Linear with a pre-transposed weight: y = x @ W^T + b (W^T in VMEM).
        return jnp.dot(x, wt_ref[...], preferred_element_type=jnp.float32) + b_ref[...]

    def ent(e):
        # entropy(): softmax over dim=1, -sum(p*log2(p)) / sqrt(d), shape [N,1].
        # log-sum-exp form:  H = (log(se) - sum(ex*(e-m))/se) / ln2 / sqrt(d).
        # Padded feature columns are pushed to -1e9 (finite, so e-m stays
        # finite) -> exp underflows to exactly 0 and drops out of both sums;
        # no second select and no full-width p = ex/se multiply needed.
        if need_mask:
            col = lax.broadcasted_iota(jnp.int32, (1, out_pad), 1)
            e = jnp.where(col < out_true, e, -1e9)
        m = jnp.max(e, axis=1, keepdims=True)
        ex = jnp.exp(e - m)
        se = jnp.sum(ex, axis=1, keepdims=True)
        num = jnp.sum(ex * (e - m), axis=1, keepdims=True)
        # Exact [N,1] division (not approx reciprocal) to stay inside the
        # accuracy budget.
        return (jnp.log(se) - num / se) * (inv_ln2 * inv_sqrt)

    def common(cls, stu, exer, w3, b3, w4, b4, w5, b5, w6, b6):
        # s2c = mean(linear3(stu)) == linear3(mean(stu))  (Linear is affine).
        mean_stu = jnp.mean(stu, axis=0, keepdims=True)        # [1, IN]
        s2c = lin(mean_stu, w3, b3)                            # [1, OUT]
        c2s = lin(cls, w3, b3) * inv_n_stu                     # [1, OUT]
        s2s = lin(stu, w4, b4)                                 # [S, OUT]
        c2c = lin(cls, w5, b5)                                 # [1, OUT]
        e2e = lin(exer, w6, b6)                                # [E, OUT]
        return s2c, c2s, s2s, c2c, e2e

    def kernel_both(adj_t_ref, adj_f_ref, class_ref, stu_ref, exer_ref,
                    w1, b1, w2, b2, w3, b3, w4, b4, w5, b5, w6, b6,
                    class_out, stu_out, exer_out):
        cls = class_ref[...]
        stu = stu_ref[...]
        exer = exer_ref[...]
        # bf16 in HBM (exact for 0/1), upcast once in VMEM.
        adj_t = adj_t_ref[...].astype(jnp.float32)
        adj_f = adj_f_ref[...].astype(jnp.float32)

        # Per-graph message passing; each result feeds its linear directly
        # (no concat/slice round-trips -> no extra VMEM copies).
        stu_t = lin(jnp.dot(adj_t, exer, preferred_element_type=jnp.float32),
                    w1, b1)                                            # [S, OUT]
        stu_f = lin(jnp.dot(adj_f, exer, preferred_element_type=jnp.float32),
                    w2, b2)                                            # [S, OUT]
        exer_t = lin(lax.dot_general(adj_t, stu, trans_dims,
                                     preferred_element_type=jnp.float32),
                     w1, b1)                                           # [E, OUT]
        exer_f = lin(lax.dot_general(adj_f, stu, trans_dims,
                                     preferred_element_type=jnp.float32),
                     w2, b2)                                           # [E, OUT]

        s2c, c2s, s2s, c2c, e2e = common(cls, stu, exer,
                                         w3, b3, w4, b4, w5, b5, w6, b6)

        h_c = ent(c2s)
        h_st, h_sf = ent(stu_t), ent(stu_f)
        h_et, h_ef = ent(exer_t), ent(exer_f)

        # Matches the reference: no guard on near-zero entropies.
        inv_hs = 1.0 / (h_st + h_sf + h_c)
        inv_he = 1.0 / (h_et + h_ef)

        stu_out[...] = (stu_t * (h_st * inv_hs)
                        + stu_f * (h_sf * inv_hs)
                        + c2s * (h_c * inv_hs)) * (1.0 / 3.0) + s2s
        exer_out[...] = (exer_t * (h_et * inv_he)
                         + exer_f * (h_ef * inv_he)) * 0.5 + e2e
        class_out[...] = s2c + c2c

    def kernel_single(adj_ref, class_ref, stu_ref, exer_ref,
                      wa, ba, w3, b3, w4, b4, w5, b5, w6, b6,
                      class_out, stu_out, exer_out):
        # Single-adjacency branch; wa/ba is linear1 (t-only) or linear2 (f-only).
        cls = class_ref[...]
        stu = stu_ref[...]
        exer = exer_ref[...]
        adj = adj_ref[...].astype(jnp.float32)

        stu_a = lin(jnp.dot(adj, exer, preferred_element_type=jnp.float32),
                    wa, ba)                                            # [S, OUT]
        exer_a = lin(lax.dot_general(adj, stu, trans_dims,
                                     preferred_element_type=jnp.float32),
                     wa, ba)                                           # [E, OUT]

        s2c, c2s, s2s, c2c, e2e = common(cls, stu, exer,
                                         w3, b3, w4, b4, w5, b5, w6, b6)

        h_c = ent(c2s)
        h_sa = ent(stu_a)
        inv_hs = 1.0 / (h_sa + h_c)

        stu_out[...] = (stu_a * (h_sa * inv_hs)
                        + c2s * (h_c * inv_hs)) * 0.5 + s2s
        exer_out[...] = exer_a + e2e
        class_out[...] = s2c + c2c

    return kernel_both if (has_t and has_f) else kernel_single


def gcn_layer_pallas(adj_t, adj_f, class_emb, stu_embs, exer_embs, params,
                     adj_dtype=jnp.bfloat16):
    """GCNLayer.forward.  adj_t / adj_f may be None (mirrors the PyTorch branches).

    adj_dtype=bf16 is exact for 0/1 adjacencies (the DGCD case) and halves the
    adjacency HBM traffic; pass jnp.float32 for non-binary adjacency values.
    """
    S, IN = stu_embs.shape
    E = exer_embs.shape[0]
    OUT = params["w1"].shape[0]
    has_t = adj_t is not None
    has_f = adj_f is not None
    if not (has_t or has_f):
        raise ValueError("at least one adjacency must be provided")

    f32 = jnp.float32

    def round_up(x, m):
        return ((x + m - 1) // m) * m

    # Pad feature dims to a lane-width multiple so every output store is
    # lane-dense; entropy masks the padded columns so the math is unchanged.
    IN_P = round_up(IN, 128)
    OUT_P = round_up(OUT, 128)

    def pad_cols(x, tgt):
        d = tgt - x.shape[1]
        return x if d == 0 else jnp.pad(x, ((0, 0), (0, d)))

    cls_p = pad_cols(class_emb.astype(f32), IN_P)
    stu_p = pad_cols(stu_embs.astype(f32), IN_P)
    exer_p = pad_cols(exer_embs.astype(f32), IN_P)

    # Pre-transposed ([in, out]) zero-padded weights and biases: layout plumbing
    # done once in the wrapper -> no in-kernel transposes.
    wts, bss = [], []
    for i in range(1, 7):
        w = params[f"w{i}"].astype(f32).T                      # [IN, OUT]
        w = jnp.pad(w, ((0, IN_P - IN), (0, OUT_P - OUT)))
        b = jnp.pad(params[f"b{i}"].astype(f32), ((0, 0), (0, OUT_P - OUT)))
        wts.append(w)
        bss.append(b)

    if has_t and has_f:
        inputs = (adj_t.astype(adj_dtype), adj_f.astype(adj_dtype),
                  cls_p, stu_p, exer_p,
                  wts[0], bss[0], wts[1], bss[1], wts[2], bss[2],
                  wts[3], bss[3], wts[4], bss[4], wts[5], bss[5])
    else:
        adj = (adj_t if has_t else adj_f).astype(adj_dtype)
        wa, ba = (wts[0], bss[0]) if has_t else (wts[1], bss[1])
        inputs = (adj, cls_p, stu_p, exer_p,
                  wa, ba, wts[2], bss[2], wts[3], bss[3],
                  wts[4], bss[4], wts[5], bss[5])

    kernel = _make_gcn_kernel(has_t, has_f, S, OUT, OUT_P)
    vmem = pl.BlockSpec(memory_space=pltpu.MemorySpace.VMEM)

    out_shape = (jax.ShapeDtypeStruct((1, OUT_P), f32),   # class_emb_new
                 jax.ShapeDtypeStruct((S, OUT_P), f32),   # stu_embs_new
                 jax.ShapeDtypeStruct((E, OUT_P), f32))   # exer_embs_new

    cls_o, stu_o, exer_o = pl.pallas_call(
        kernel,
        out_shape=out_shape,
        in_specs=[vmem] * len(inputs),
        out_specs=(vmem, vmem, vmem),
        compiler_params=pltpu.CompilerParams(
            vmem_limit_bytes=32 * 1024 * 1024),
    )(*inputs)

    if OUT_P != OUT:
        cls_o = cls_o[:, :OUT]
        stu_o = stu_o[:, :OUT]
        exer_o = exer_o[:, :OUT]
    return cls_o, stu_o, exer_o


def gcn_layer_ref(adj_t, adj_f, class_emb, stu, exer, p):
    """Pure-JAX reference mirroring the PyTorch forward exactly."""
    def lin(x, w, b):
        return x @ w.T + b

    def ent(e):
        pr = jax.nn.softmax(e, axis=1)
        return (-jnp.sum(pr * jnp.log2(pr + 1e-10), axis=1, keepdims=True)
                / math.sqrt(e.shape[1]))

    S = stu.shape[0]
    s2c = jnp.mean(lin(stu, p["w3"], p["b3"]), axis=0, keepdims=True)
    c2s = lin(class_emb, p["w3"], p["b3"]) / S
    s2s = lin(stu, p["w4"], p["b4"])
    c2c = lin(class_emb, p["w5"], p["b5"])
    e2e = lin(exer, p["w6"], p["b6"])
    hc = ent(c2s)
    if adj_f is None:
        st = lin(adj_t @ exer, p["w1"], p["b1"])
        et = lin(adj_t.T @ stu, p["w1"], p["b1"])
        hst = ent(st)
        hs = hst + hc
        stu_new = (st * (hst / hs) + c2s * (hc / hs)) / 2 + s2s
        exer_new = et + e2e
    elif adj_t is None:
        sf = lin(adj_f @ exer, p["w2"], p["b2"])
        ef = lin(adj_f.T @ stu, p["w2"], p["b2"])
        hsf = ent(sf)
        hs = hsf + hc
        stu_new = (sf * (hsf / hs) + c2s * (hc / hs)) / 2 + s2s
        exer_new = ef + e2e
    else:
        st = lin(adj_t @ exer, p["w1"], p["b1"])
        et = lin(adj_t.T @ stu, p["w1"], p["b1"])
        sf = lin(adj_f @ exer, p["w2"], p["b2"])
        ef = lin(adj_f.T @ stu, p["w2"], p["b2"])
        hst, het, hsf, hef = ent(st), ent(et), ent(sf), ent(ef)
        hs = hst + hsf + hc
        he = het + hef
        stu_new = (st * (hst / hs) + sf * (hsf / hs) + c2s * (hc / hs)) / 3 + s2s
        exer_new = (et * (het / he) + ef * (hef / he)) / 2 + e2e
    return s2c + c2c, stu_new, exer_new


if __name__ == "__main__":
    key = jax.random.PRNGKey(0)
    S, E, IN, OUT = 8, 16, 32, 32   # students, exercises, in_features, out_features

    ks = jax.random.split(key, 18)
    # Dense 0/1 adjacencies stand in for the PyTorch sparse adjacency matrices.
    adj_t = (jax.random.uniform(ks[0], (S, E)) < 0.5).astype(jnp.float32)
    adj_f = (jax.random.uniform(ks[1], (S, E)) < 0.5).astype(jnp.float32)
    class_emb = jax.random.normal(ks[2], (1, IN), jnp.float32)
    stu_embs = jax.random.normal(ks[3], (S, IN), jnp.float32)
    exer_embs = jax.random.normal(ks[4], (E, IN), jnp.float32)

    # Deterministic nn.Linear-style init: U(-1/sqrt(in), 1/sqrt(in)).
    bound = 1.0 / math.sqrt(IN)
    params = {}
    for i in range(6):
        params[f"w{i + 1}"] = jax.random.uniform(
            ks[5 + 2 * i], (OUT, IN), jnp.float32, -bound, bound)
        params[f"b{i + 1}"] = jax.random.uniform(
            ks[6 + 2 * i], (1, OUT), jnp.float32, -bound, bound)

    # Exercise all three forward branches (both adjacencies, t-only, f-only).
    # Tolerance slightly loosened vs 1e-4: the log-sum-exp entropy reassociates
    # f32 sums and drops the reference's +1e-10 epsilon (both ~1e-6 effects);
    # the bf16 adjacency is exact for 0/1 values and adds no error.
    for at, af in [(adj_t, adj_f), (adj_t, None), (None, adj_f)]:
        outs = gcn_layer_pallas(at, af, class_emb, stu_embs, exer_embs, params)
        outs = jax.block_until_ready(outs)
        refs = gcn_layer_ref(at, af, class_emb, stu_embs, exer_embs, params)
        for o, r in zip(outs, refs):
            assert o.shape == r.shape and o.dtype == r.dtype
            assert jnp.allclose(o, r, atol=5e-4, rtol=5e-4), float(
                jnp.max(jnp.abs(o - r)))

    # TODO(synk): RelaxedBernoulli import and .clone().detach() in the original
    # file have no forward-pass effect; omitted.
    print("KERNEL_OK")
</pallas_src>

<mosaic_0001>
module attributes {stable_mosaic.version = 11 : i64} {
  func.func @kernel_both(%arg0: memref<8x16xbf16, #tpu.memory_space<vmem>>, %arg1: memref<8x16xbf16, #tpu.memory_space<vmem>>, %arg2: memref<1x128xf32, #tpu.memory_space<vmem>>, %arg3: memref<8x128xf32, #tpu.memory_space<vmem>>, %arg4: memref<16x128xf32, #tpu.memory_space<vmem>>, %arg5: memref<128x128xf32, #tpu.memory_space<vmem>>, %arg6: memref<1x128xf32, #tpu.memory_space<vmem>>, %arg7: memref<128x128xf32, #tpu.memory_space<vmem>>, %arg8: memref<1x128xf32, #tpu.memory_space<vmem>>, %arg9: memref<128x128xf32, #tpu.memory_space<vmem>>, %arg10: memref<1x128xf32, #tpu.memory_space<vmem>>, %arg11: memref<128x128xf32, #tpu.memory_space<vmem>>, %arg12: memref<1x128xf32, #tpu.memory_space<vmem>>, %arg13: memref<128x128xf32, #tpu.memory_space<vmem>>, %arg14: memref<1x128xf32, #tpu.memory_space<vmem>>, %arg15: memref<128x128xf32, #tpu.memory_space<vmem>>, %arg16: memref<1x128xf32, #tpu.memory_space<vmem>>, %arg17: memref<1x128xf32, #tpu.memory_space<vmem>>, %arg18: memref<8x128xf32, #tpu.memory_space<vmem>>, %arg19: memref<16x128xf32, #tpu.memory_space<vmem>>) attributes {dimension_semantics = [], scalar_prefetch = 0 : i64, scratch_operands = 0 : i64, tpu.core_type = #tpu.core_type<tc>} {
    %c0 = arith.constant 0 : index
    %c0_0 = arith.constant 0 : index
    %0 = vector.load %arg2[%c0, %c0_0] : memref<1x128xf32, #tpu.memory_space<vmem>>, vector<1x128xf32>
    %c0_1 = arith.constant 0 : index
    %c0_2 = arith.constant 0 : index
    %1 = vector.load %arg3[%c0_1, %c0_2] : memref<8x128xf32, #tpu.memory_space<vmem>>, vector<8x128xf32>
    %c0_3 = arith.constant 0 : index
    %c0_4 = arith.constant 0 : index
    %2 = vector.load %arg4[%c0_3, %c0_4] : memref<16x128xf32, #tpu.memory_space<vmem>>, vector<16x128xf32>
    %c0_5 = arith.constant 0 : index
    %c0_6 = arith.constant 0 : index
    %3 = vector.load %arg0[%c0_5, %c0_6] : memref<8x16xbf16, #tpu.memory_space<vmem>>, vector<8x16xbf16>
    %4 = arith.extf %3 : vector<8x16xbf16> to vector<8x16xf32>
    %c0_7 = arith.constant 0 : index
    %c0_8 = arith.constant 0 : index
    %5 = vector.load %arg1[%c0_7, %c0_8] : memref<8x16xbf16, #tpu.memory_space<vmem>>, vector<8x16xbf16>
    %6 = arith.extf %5 : vector<8x16xbf16> to vector<8x16xf32>
    %cst = arith.constant dense<0.000000e+00> : vector<8x128xf32>
    %7 = tpu.matmul %4, %2, %cst {dimension_numbers = #tpu.dot_dimension_numbers<[1], [0], [0], [1], [0, 0, 1, 1], [], []>} : vector<8x16xf32>, vector<16x128xf32>, vector<8x128xf32> -> vector<8x128xf32>
    %c0_9 = arith.constant 0 : index
    %c0_10 = arith.constant 0 : index
    %8 = vector.load %arg5[%c0_9, %c0_10] : memref<128x128xf32, #tpu.memory_space<vmem>>, vector<128x128xf32>
    %cst_11 = arith.constant dense<0.000000e+00> : vector<8x128xf32>
    %9 = tpu.matmul %7, %8, %cst_11 {dimension_numbers = #tpu.dot_dimension_numbers<[1], [0], [0], [1], [0, 0, 1, 1], [], []>} : vector<8x128xf32>, vector<128x128xf32>, vector<8x128xf32> -> vector<8x128xf32>
    %c0_12 = arith.constant 0 : index
    %c0_13 = arith.constant 0 : index
    %10 = vector.load %arg6[%c0_12, %c0_13] : memref<1x128xf32, #tpu.memory_space<vmem>>, vector<1x128xf32>
    %11 = vector.broadcast %10 : vector<1x128xf32> to vector<8x128xf32>
    %12 = arith.addf %9, %11 : vector<8x128xf32>
    %cst_14 = arith.constant dense<0.000000e+00> : vector<8x128xf32>
    %13 = tpu.matmul %6, %2, %cst_14 {dimension_numbers = #tpu.dot_dimension_numbers<[1], [0], [0], [1], [0, 0, 1, 1], [], []>} : vector<8x16xf32>, vector<16x128xf32>, vector<8x128xf32> -> vector<8x128xf32>
    %c0_15 = arith.constant 0 : index
    %c0_16 = arith.constant 0 : index
    %14 = vector.load %arg7[%c0_15, %c0_16] : memref<128x128xf32, #tpu.memory_space<vmem>>, vector<128x128xf32>
    %cst_17 = arith.constant dense<0.000000e+00> : vector<8x128xf32>
    %15 = tpu.matmul %13, %14, %cst_17 {dimension_numbers = #tpu.dot_dimension_numbers<[1], [0], [0], [1], [0, 0, 1, 1], [], []>} : vector<8x128xf32>, vector<128x128xf32>, vector<8x128xf32> -> vector<8x128xf32>
    %c0_18 = arith.constant 0 : index
    %c0_19 = arith.constant 0 : index
    %16 = vector.load %arg8[%c0_18, %c0_19] : memref<1x128xf32, #tpu.memory_space<vmem>>, vector<1x128xf32>
    %17 = vector.broadcast %16 : vector<1x128xf32> to vector<8x128xf32>
    %18 = arith.addf %15, %17 : vector<8x128xf32>
    %cst_20 = arith.constant dense<0.000000e+00> : vector<16x128xf32>
    %19 = tpu.matmul %4, %1, %cst_20 {dimension_numbers = #tpu.dot_dimension_numbers<[0], [0], [1], [1], [0, 1, 1, 1], [], []>} : vector<8x16xf32>, vector<8x128xf32>, vector<16x128xf32> -> vector<16x128xf32>
    %c0_21 = arith.constant 0 : index
    %c0_22 = arith.constant 0 : index
    %20 = vector.load %arg5[%c0_21, %c0_22] : memref<128x128xf32, #tpu.memory_space<vmem>>, vector<128x128xf32>
    %cst_23 = arith.constant dense<0.000000e+00> : vector<16x128xf32>
    %21 = tpu.matmul %19, %20, %cst_23 {dimension_numbers = #tpu.dot_dimension_numbers<[1], [0], [0], [1], [0, 0, 1, 1], [], []>} : vector<16x128xf32>, vector<128x128xf32>, vector<16x128xf32> -> vector<16x128xf32>
    %c0_24 = arith.constant 0 : index
    %c0_25 = arith.constant 0 : index
    %22 = vector.load %arg6[%c0_24, %c0_25] : memref<1x128xf32, #tpu.memory_space<vmem>>, vector<1x128xf32>
    %23 = vector.broadcast %22 : vector<1x128xf32> to vector<16x128xf32>
    %24 = arith.addf %21, %23 : vector<16x128xf32>
    %cst_26 = arith.constant dense<0.000000e+00> : vector<16x128xf32>
    %25 = tpu.matmul %6, %1, %cst_26 {dimension_numbers = #tpu.dot_dimension_numbers<[0], [0], [1], [1], [0, 1, 1, 1], [], []>} : vector<8x16xf32>, vector<8x128xf32>, vector<16x128xf32> -> vector<16x128xf32>
    %c0_27 = arith.constant 0 : index
    %c0_28 = arith.constant 0 : index
    %26 = vector.load %arg7[%c0_27, %c0_28] : memref<128x128xf32, #tpu.memory_space<vmem>>, vector<128x128xf32>
    %cst_29 = arith.constant dense<0.000000e+00> : vector<16x128xf32>
    %27 = tpu.matmul %25, %26, %cst_29 {dimension_numbers = #tpu.dot_dimension_numbers<[1], [0], [0], [1], [0, 0, 1, 1], [], []>} : vector<16x128xf32>, vector<128x128xf32>, vector<16x128xf32> -> vector<16x128xf32>
    %c0_30 = arith.constant 0 : index
    %c0_31 = arith.constant 0 : index
    %28 = vector.load %arg8[%c0_30, %c0_31] : memref<1x128xf32, #tpu.memory_space<vmem>>, vector<1x128xf32>
    %29 = vector.broadcast %28 : vector<1x128xf32> to vector<16x128xf32>
    %30 = arith.addf %27, %29 : vector<16x128xf32>
    %cst_32 = arith.constant dense<0.000000e+00> : vector<128xf32>
    %31 = vector.multi_reduction <add>, %1, %cst_32 [0] : vector<8x128xf32> to vector<128xf32>
    %32 = vector.shape_cast %31 : vector<128xf32> to vector<1x128xf32>
    %cst_33 = arith.constant 8.000000e+00 : f32
    %33 = vector.broadcast %cst_33 : f32 to vector<1x128xf32>
    %34 = arith.divf %32, %33 : vector<1x128xf32>
    %c0_34 = arith.constant 0 : index
    %c0_35 = arith.constant 0 : index
    %35 = vector.load %arg9[%c0_34, %c0_35] : memref<128x128xf32, #tpu.memory_space<vmem>>, vector<128x128xf32>
    %cst_36 = arith.constant dense<0.000000e+00> : vector<1x128xf32>
    %36 = tpu.matmul %34, %35, %cst_36 {dimension_numbers = #tpu.dot_dimension_numbers<[1], [0], [0], [1], [0, 0, 1, 1], [], []>} : vector<1x128xf32>, vector<128x128xf32>, vector<1x128xf32> -> vector<1x128xf32>
    %c0_37 = arith.constant 0 : index
    %c0_38 = arith.constant 0 : index
    %37 = vector.load %arg10[%c0_37, %c0_38] : memref<1x128xf32, #tpu.memory_space<vmem>>, vector<1x128xf32>
    %38 = arith.addf %36, %37 : vector<1x128xf32>
    %c0_39 = arith.constant 0 : index
    %c0_40 = arith.constant 0 : index
    %39 = vector.load %arg9[%c0_39, %c0_40] : memref<128x128xf32, #tpu.memory_space<vmem>>, vector<128x128xf32>
    %cst_41 = arith.constant dense<0.000000e+00> : vector<1x128xf32>
    %40 = tpu.matmul %0, %39, %cst_41 {dimension_numbers = #tpu.dot_dimension_numbers<[1], [0], [0], [1], [0, 0, 1, 1], [], []>} : vector<1x128xf32>, vector<128x128xf32>, vector<1x128xf32> -> vector<1x128xf32>
    %c0_42 = arith.constant 0 : index
    %c0_43 = arith.constant 0 : index
    %41 = vector.load %arg10[%c0_42, %c0_43] : memref<1x128xf32, #tpu.memory_space<vmem>>, vector<1x128xf32>
    %42 = arith.addf %40, %41 : vector<1x128xf32>
    %cst_44 = arith.constant 1.250000e-01 : f32
    %43 = vector.broadcast %cst_44 : f32 to vector<1x128xf32>
    %44 = arith.mulf %42, %43 : vector<1x128xf32>
    %c0_45 = arith.constant 0 : index
    %c0_46 = arith.constant 0 : index
    %45 = vector.load %arg11[%c0_45, %c0_46] : memref<128x128xf32, #tpu.memory_space<vmem>>, vector<128x128xf32>
    %cst_47 = arith.constant dense<0.000000e+00> : vector<8x128xf32>
    %46 = tpu.matmul %1, %45, %cst_47 {dimension_numbers = #tpu.dot_dimension_numbers<[1], [0], [0], [1], [0, 0, 1, 1], [], []>} : vector<8x128xf32>, vector<128x128xf32>, vector<8x128xf32> -> vector<8x128xf32>
    %c0_48 = arith.constant 0 : index
    %c0_49 = arith.constant 0 : index
    %47 = vector.load %arg12[%c0_48, %c0_49] : memref<1x128xf32, #tpu.memory_space<vmem>>, vector<1x128xf32>
    %48 = vector.broadcast %47 : vector<1x128xf32> to vector<8x128xf32>
    %49 = arith.addf %46, %48 : vector<8x128xf32>
    %c0_50 = arith.constant 0 : index
    %c0_51 = arith.constant 0 : index
    %50 = vector.load %arg13[%c0_50, %c0_51] : memref<128x128xf32, #tpu.memory_space<vmem>>, vector<128x128xf32>
    %cst_52 = arith.constant dense<0.000000e+00> : vector<1x128xf32>
    %51 = tpu.matmul %0, %50, %cst_52 {dimension_numbers = #tpu.dot_dimension_numbers<[1], [0], [0], [1], [0, 0, 1, 1], [], []>} : vector<1x128xf32>, vector<128x128xf32>, vector<1x128xf32> -> vector<1x128xf32>
    %c0_53 = arith.constant 0 : index
    %c0_54 = arith.constant 0 : index
    %52 = vector.load %arg14[%c0_53, %c0_54] : memref<1x128xf32, #tpu.memory_space<vmem>>, vector<1x128xf32>
    %53 = arith.addf %51, %52 : vector<1x128xf32>
    %c0_55 = arith.constant 0 : index
    %c0_56 = arith.constant 0 : index
    %54 = vector.load %arg15[%c0_55, %c0_56] : memref<128x128xf32, #tpu.memory_space<vmem>>, vector<128x128xf32>
    %cst_57 = arith.constant dense<0.000000e+00> : vector<16x128xf32>
    %55 = tpu.matmul %2, %54, %cst_57 {dimension_numbers = #tpu.dot_dimension_numbers<[1], [0], [0], [1], [0, 0, 1, 1], [], []>} : vector<16x128xf32>, vector<128x128xf32>, vector<16x128xf32> -> vector<16x128xf32>
    %c0_58 = arith.constant 0 : index
    %c0_59 = arith.constant 0 : index
    %56 = vector.load %arg16[%c0_58, %c0_59] : memref<1x128xf32, #tpu.memory_space<vmem>>, vector<1x128xf32>
    %57 = vector.broadcast %56 : vector<1x128xf32> to vector<16x128xf32>
    %58 = arith.addf %55, %57 : vector<16x128xf32>
    %59 = tpu.iota {dimensions = array<i32: 1>} : vector<1x128xi32>
    %c32_i32 = arith.constant 32 : i32
    %60 = vector.broadcast %c32_i32 : i32 to vector<1x128xi32>
    %61 = arith.cmpi slt, %59, %60 : vector<1x128xi32>
    %cst_60 = arith.constant -1.000000e+09 : f32
    %62 = vector.broadcast %cst_60 : f32 to vector<1x128xf32>
    %63 = arith.select %61, %44, %62 : vector<1x128xi1>, vector<1x128xf32>
    %cst_61 = arith.constant dense<0xFF800000> : vector<1xf32>
    %64 = vector.multi_reduction <maximumf>, %63, %cst_61 [1] : vector<1x128xf32> to vector<1xf32>
    %65 = vector.shape_cast %64 : vector<1xf32> to vector<1x1xf32>
    %66 = vector.broadcast %65 : vector<1x1xf32> to vector<1x128xf32>
    %67 = arith.subf %63, %66 : vector<1x128xf32>
    %68 = math.exp %67 : vector<1x128xf32>
    %cst_62 = arith.constant dense<0.000000e+00> : vector<1xf32>
    %69 = vector.multi_reduction <add>, %68, %cst_62 [1] : vector<1x128xf32> to vector<1xf32>
    %70 = vector.shape_cast %69 : vector<1xf32> to vector<1x1xf32>
    %71 = vector.broadcast %65 : vector<1x1xf32> to vector<1x128xf32>
    %72 = arith.subf %63, %71 : vector<1x128xf32>
    %73 = arith.mulf %68, %72 : vector<1x128xf32>
    %cst_63 = arith.constant dense<0.000000e+00> : vector<1xf32>
    %74 = vector.multi_reduction <add>, %73, %cst_63 [1] : vector<1x128xf32> to vector<1xf32>
    %75 = vector.shape_cast %74 : vector<1xf32> to vector<1x1xf32>
    %76 = math.log %70 : vector<1x1xf32>
    %77 = arith.divf %75, %70 : vector<1x1xf32>
    %78 = arith.subf %76, %77 : vector<1x1xf32>
    %cst_64 = arith.constant 0.255034864 : f32
    %79 = vector.broadcast %cst_64 : f32 to vector<1x1xf32>
    %80 = arith.mulf %78, %79 : vector<1x1xf32>
    %81 = tpu.iota {dimensions = array<i32: 1>} : vector<1x128xi32>
    %c32_i32_65 = arith.constant 32 : i32
    %82 = vector.broadcast %c32_i32_65 : i32 to vector<1x128xi32>
    %83 = arith.cmpi slt, %81, %82 : vector<1x128xi32>
    %cst_66 = arith.constant -1.000000e+09 : f32
    %84 = vector.shape_cast %83 : vector<1x128xi1> to vector<1x128xi1>
    %85 = vector.broadcast %84 : vector<1x128xi1> to vector<8x128xi1>
    %86 = vector.broadcast %cst_66 : f32 to vector<8x128xf32>
    %87 = arith.select %85, %12, %86 : vector<8x128xi1>, vector<8x128xf32>
    %cst_67 = arith.constant dense<0xFF800000> : vector<8xf32>
    %88 = vector.multi_reduction <maximumf>, %87, %cst_67 [1] : vector<8x128xf32> to vector<8xf32>
    %89 = vector.shape_cast %88 : vector<8xf32> to vector<8x1xf32>
    %90 = vector.broadcast %89 : vector<8x1xf32> to vector<8x128xf32>
    %91 = arith.subf %87, %90 : vector<8x128xf32>
    %92 = math.exp %91 : vector<8x128xf32>
    %cst_68 = arith.constant dense<0.000000e+00> : vector<8xf32>
    %93 = vector.multi_reduction <add>, %92, %cst_68 [1] : vector<8x128xf32> to vector<8xf32>
    %94 = vector.shape_cast %93 : vector<8xf32> to vector<8x1xf32>
    %95 = vector.broadcast %89 : vector<8x1xf32> to vector<8x128xf32>
    %96 = arith.subf %87, %95 : vector<8x128xf32>
    %97 = arith.mulf %92, %96 : vector<8x128xf32>
    %cst_69 = arith.constant dense<0.000000e+00> : vector<8xf32>
    %98 = vector.multi_reduction <add>, %97, %cst_69 [1] : vector<8x128xf32> to vector<8xf32>
    %99 = vector.shape_cast %98 : vector<8xf32> to vector<8x1xf32>
    %100 = math.log %94 : vector<8x1xf32>
    %101 = arith.divf %99, %94 : vector<8x1xf32>
    %102 = arith.subf %100, %101 : vector<8x1xf32>
    %cst_70 = arith.constant 0.255034864 : f32
    %103 = vector.broadcast %cst_70 : f32 to vector<8x1xf32>
    %104 = arith.mulf %102, %103 : vector<8x1xf32>
    %105 = tpu.iota {dimensions = array<i32: 1>} : vector<1x128xi32>
    %c32_i32_71 = arith.constant 32 : i32
    %106 = vector.broadcast %c32_i32_71 : i32 to vector<1x128xi32>
    %107 = arith.cmpi slt, %105, %106 : vector<1x128xi32>
    %cst_72 = arith.constant -1.000000e+09 : f32
    %108 = vector.shape_cast %107 : vector<1x128xi1> to vector<1x128xi1>
    %109 = vector.broadcast %108 : vector<1x128xi1> to vector<8x128xi1>
    %110 = vector.broadcast %cst_72 : f32 to vector<8x128xf32>
    %111 = arith.select %109, %18, %110 : vector<8x128xi1>, vector<8x128xf32>
    %cst_73 = arith.constant dense<0xFF800000> : vector<8xf32>
    %112 = vector.multi_reduction <maximumf>, %111, %cst_73 [1] : vector<8x128xf32> to vector<8xf32>
    %113 = vector.shape_cast %112 : vector<8xf32> to vector<8x1xf32>
    %114 = vector.broadcast %113 : vector<8x1xf32> to vector<8x128xf32>
    %115 = arith.subf %111, %114 : vector<8x128xf32>
    %116 = math.exp %115 : vector<8x128xf32>
    %cst_74 = arith.constant dense<0.000000e+00> : vector<8xf32>
    %117 = vector.multi_reduction <add>, %116, %cst_74 [1] : vector<8x128xf32> to vector<8xf32>
    %118 = vector.shape_cast %117 : vector<8xf32> to vector<8x1xf32>
    %119 = vector.broadcast %113 : vector<8x1xf32> to vector<8x128xf32>
    %120 = arith.subf %111, %119 : vector<8x128xf32>
    %121 = arith.mulf %116, %120 : vector<8x128xf32>
    %cst_75 = arith.constant dense<0.000000e+00> : vector<8xf32>
    %122 = vector.multi_reduction <add>, %121, %cst_75 [1] : vector<8x128xf32> to vector<8xf32>
    %123 = vector.shape_cast %122 : vector<8xf32> to vector<8x1xf32>
    %124 = math.log %118 : vector<8x1xf32>
    %125 = arith.divf %123, %118 : vector<8x1xf32>
    %126 = arith.subf %124, %125 : vector<8x1xf32>
    %cst_76 = arith.constant 0.255034864 : f32
    %127 = vector.broadcast %cst_76 : f32 to vector<8x1xf32>
    %128 = arith.mulf %126, %127 : vector<8x1xf32>
    %129 = tpu.iota {dimensions = array<i32: 1>} : vector<1x128xi32>
    %c32_i32_77 = arith.constant 32 : i32
    %130 = vector.broadcast %c32_i32_77 : i32 to vector<1x128xi32>
    %131 = arith.cmpi slt, %129, %130 : vector<1x128xi32>
    %cst_78 = arith.constant -1.000000e+09 : f32
    %132 = vector.shape_cast %131 : vector<1x128xi1> to vector<1x128xi1>
    %133 = vector.broadcast %132 : vector<1x128xi1> to vector<16x128xi1>
    %134 = vector.broadcast %cst_78 : f32 to vector<16x128xf32>
    %135 = arith.select %133, %24, %134 : vector<16x128xi1>, vector<16x128xf32>
    %cst_79 = arith.constant dense<0xFF800000> : vector<16xf32>
    %136 = vector.multi_reduction <maximumf>, %135, %cst_79 [1] : vector<16x128xf32> to vector<16xf32>
    %137 = vector.shape_cast %136 : vector<16xf32> to vector<16x1xf32>
    %138 = vector.broadcast %137 : vector<16x1xf32> to vector<16x128xf32>
    %139 = arith.subf %135, %138 : vector<16x128xf32>
    %140 = math.exp %139 : vector<16x128xf32>
    %cst_80 = arith.constant dense<0.000000e+00> : vector<16xf32>
    %141 = vector.multi_reduction <add>, %140, %cst_80 [1] : vector<16x128xf32> to vector<16xf32>
    %142 = vector.shape_cast %141 : vector<16xf32> to vector<16x1xf32>
    %143 = vector.broadcast %137 : vector<16x1xf32> to vector<16x128xf32>
    %144 = arith.subf %135, %143 : vector<16x128xf32>
    %145 = arith.mulf %140, %144 : vector<16x128xf32>
    %cst_81 = arith.constant dense<0.000000e+00> : vector<16xf32>
    %146 = vector.multi_reduction <add>, %145, %cst_81 [1] : vector<16x128xf32> to vector<16xf32>
    %147 = vector.shape_cast %146 : vector<16xf32> to vector<16x1xf32>
    %148 = math.log %142 : vector<16x1xf32>
    %149 = arith.divf %147, %142 : vector<16x1xf32>
    %150 = arith.subf %148, %149 : vector<16x1xf32>
    %cst_82 = arith.constant 0.255034864 : f32
    %151 = vector.broadcast %cst_82 : f32 to vector<16x1xf32>
    %152 = arith.mulf %150, %151 : vector<16x1xf32>
    %153 = tpu.iota {dimensions = array<i32: 1>} : vector<1x128xi32>
    %c32_i32_83 = arith.constant 32 : i32
    %154 = vector.broadcast %c32_i32_83 : i32 to vector<1x128xi32>
    %155 = arith.cmpi slt, %153, %154 : vector<1x128xi32>
    %cst_84 = arith.constant -1.000000e+09 : f32
    %156 = vector.shape_cast %155 : vector<1x128xi1> to vector<1x128xi1>
    %157 = vector.broadcast %156 : vector<1x128xi1> to vector<16x128xi1>
    %158 = vector.broadcast %cst_84 : f32 to vector<16x128xf32>
    %159 = arith.select %157, %30, %158 : vector<16x128xi1>, vector<16x128xf32>
    %cst_85 = arith.constant dense<0xFF800000> : vector<16xf32>
    %160 = vector.multi_reduction <maximumf>, %159, %cst_85 [1] : vector<16x128xf32> to vector<16xf32>
    %161 = vector.shape_cast %160 : vector<16xf32> to vector<16x1xf32>
    %162 = vector.broadcast %161 : vector<16x1xf32> to vector<16x128xf32>
    %163 = arith.subf %159, %162 : vector<16x128xf32>
    %164 = math.exp %163 : vector<16x128xf32>
    %cst_86 = arith.constant dense<0.000000e+00> : vector<16xf32>
    %165 = vector.multi_reduction <add>, %164, %cst_86 [1] : vector<16x128xf32> to vector<16xf32>
    %166 = vector.shape_cast %165 : vector<16xf32> to vector<16x1xf32>
    %167 = vector.broadcast %161 : vector<16x1xf32> to vector<16x128xf32>
    %168 = arith.subf %159, %167 : vector<16x128xf32>
    %169 = arith.mulf %164, %168 : vector<16x128xf32>
    %cst_87 = arith.constant dense<0.000000e+00> : vector<16xf32>
    %170 = vector.multi_reduction <add>, %169, %cst_87 [1] : vector<16x128xf32> to vector<16xf32>
    %171 = vector.shape_cast %170 : vector<16xf32> to vector<16x1xf32>
    %172 = math.log %166 : vector<16x1xf32>
    %173 = arith.divf %171, %166 : vector<16x1xf32>
    %174 = arith.subf %172, %173 : vector<16x1xf32>
    %cst_88 = arith.constant 0.255034864 : f32
    %175 = vector.broadcast %cst_88 : f32 to vector<16x1xf32>
    %176 = arith.mulf %174, %175 : vector<16x1xf32>
    %177 = arith.addf %104, %128 : vector<8x1xf32>
    %178 = vector.broadcast %80 : vector<1x1xf32> to vector<8x1xf32>
    %179 = arith.addf %177, %178 : vector<8x1xf32>
    %cst_89 = arith.constant 1.000000e+00 : f32
    %180 = vector.broadcast %cst_89 : f32 to vector<8x1xf32>
    %181 = arith.divf %180, %179 : vector<8x1xf32>
    %182 = arith.addf %152, %176 : vector<16x1xf32>
    %cst_90 = arith.constant 1.000000e+00 : f32
    %183 = vector.broadcast %cst_90 : f32 to vector<16x1xf32>
    %184 = arith.divf %183, %182 : vector<16x1xf32>
    %185 = arith.mulf %104, %181 : vector<8x1xf32>
    %186 = vector.broadcast %185 : vector<8x1xf32> to vector<8x128xf32>
    %187 = arith.mulf %12, %186 : vector<8x128xf32>
    %188 = arith.mulf %128, %181 : vector<8x1xf32>
    %189 = vector.broadcast %188 : vector<8x1xf32> to vector<8x128xf32>
    %190 = arith.mulf %18, %189 : vector<8x128xf32>
    %191 = arith.addf %187, %190 : vector<8x128xf32>
    %192 = vector.broadcast %80 : vector<1x1xf32> to vector<8x1xf32>
    %193 = arith.mulf %192, %181 : vector<8x1xf32>
    %194 = vector.broadcast %44 : vector<1x128xf32> to vector<8x128xf32>
    %195 = vector.broadcast %193 : vector<8x1xf32> to vector<8x128xf32>
    %196 = arith.mulf %194, %195 : vector<8x128xf32>
    %197 = arith.addf %191, %196 : vector<8x128xf32>
    %cst_91 = arith.constant 0.333333343 : f32
    %198 = vector.broadcast %cst_91 : f32 to vector<8x128xf32>
    %199 = arith.mulf %197, %198 : vector<8x128xf32>
    %200 = arith.addf %199, %49 : vector<8x128xf32>
    %c0_92 = arith.constant 0 : index
    %c0_93 = arith.constant 0 : index
    %201 = vector.load %arg18[%c0_92, %c0_93] : memref<8x128xf32, #tpu.memory_space<vmem>>, vector<8x128xf32>
    tpu.vector_store %arg18[%c0_92, %c0_93], %200 {strides = array<i32>} : memref<8x128xf32, #tpu.memory_space<vmem>>, vector<8x128xf32>,
    %202 = arith.mulf %152, %184 : vector<16x1xf32>
    %203 = vector.broadcast %202 : vector<16x1xf32> to vector<16x128xf32>
    %204 = arith.mulf %24, %203 : vector<16x128xf32>
    %205 = arith.mulf %176, %184 : vector<16x1xf32>
    %206 = vector.broadcast %205 : vector<16x1xf32> to vector<16x128xf32>
    %207 = arith.mulf %30, %206 : vector<16x128xf32>
    %208 = arith.addf %204, %207 : vector<16x128xf32>
    %cst_94 = arith.constant 5.000000e-01 : f32
    %209 = vector.broadcast %cst_94 : f32 to vector<16x128xf32>
    %210 = arith.mulf %208, %209 : vector<16x128xf32>
    %211 = arith.addf %210, %58 : vector<16x128xf32>
    %c0_95 = arith.constant 0 : index
    %c0_96 = arith.constant 0 : index
    %212 = vector.load %arg19[%c0_95, %c0_96] : memref<16x128xf32, #tpu.memory_space<vmem>>, vector<16x128xf32>
    tpu.vector_store %arg19[%c0_95, %c0_96], %211 {strides = array<i32>} : memref<16x128xf32, #tpu.memory_space<vmem>>, vector<16x128xf32>,
    %213 = arith.addf %38, %53 : vector<1x128xf32>
    %c0_97 = arith.constant 0 : index
    %c0_98 = arith.constant 0 : index
    %214 = vector.load %arg17[%c0_97, %c0_98] : memref<1x128xf32, #tpu.memory_space<vmem>>, vector<1x128xf32>
    tpu.vector_store %arg17[%c0_97, %c0_98], %213 {strides = array<i32>} : memref<1x128xf32, #tpu.memory_space<vmem>>, vector<1x128xf32>,
    return
  }
}

</mosaic_0001>

<bundles_post_ra>
// kernel: tpu_custom_call.1
= control target key start
LH: loop header
LB: loop body
LE: loop exit
PB: predicated region body
PF: predicated region fallthrough
CT: control target
= control target key end

     0   :  { %s1989_s0 = inlined_call_operand.hbm [shape: bf16[8,16], index: 0, kind: input, shape index: {}]   ;;  %s1990_s1 = inlined_call_operand.hbm [shape: bf16[8,16], index: 1, kind: input, shape index: {}]   ;;  %s1991_s2 = inlined_call_operand.vmem [shape: f32[1,128], index: 2, kind: input, shape index: {}]   ;;  %s1992_s3 = inlined_call_operand.hbm [shape: f32[8,128], index: 3, kind: input, shape index: {}]   ;;  %s1993_s4 = inlined_call_operand.hbm [shape: f32[16,128], index: 4, kind: input, shape index: {}]   ;;  %s1994_s5 = inlined_call_operand.hbm [shape: f32[128,128], index: 5, kind: input, shape index: {}]   ;;  %s1995_s6 = inlined_call_operand.vmem [shape: f32[1,128], index: 6, kind: input, shape index: {}]   ;;  %s1996_s7 = inlined_call_operand.hbm [shape: f32[128,128], index: 7, kind: input, shape index: {}]   ;;  %s1997_s8 = inlined_call_operand.vmem [shape: f32[1,128], index: 8, kind: input, shape index: {}]   ;;  %s1998_s9 = inlined_call_operand.hbm [shape: f32[128,128], index: 9, kind: input, shape index: {}]   ;;  %s1999_s10 = inlined_call_operand.vmem [shape: f32[1,128], index: 10, kind: input, shape index: {}]   ;;  %s2000_s11 = inlined_call_operand.hbm [shape: f32[128,128], index: 11, kind: input, shape index: {}]   ;;  %s2001_s12 = inlined_call_operand.vmem [shape: f32[1,128], index: 12, kind: input, shape index: {}]   ;;  %s2002_s13 = inlined_call_operand.hbm [shape: f32[128,128], index: 13, kind: input, shape index: {}]   ;;  %s2003_s14 = inlined_call_operand.vmem [shape: f32[1,128], index: 14, kind: input, shape index: {}]   ;;  %s2004_s15 = inlined_call_operand.hbm [shape: f32[128,128], index: 15, kind: input, shape index: {}]   ;;  %s2005_s16 = inlined_call_operand.vmem [shape: f32[1,128], index: 16, kind: input, shape index: {}]   ;;  %s2006_s17 = inlined_call_operand.hbm [shape: f32[1,128], index: 17, kind: output, shape index: {0}]   ;;  %s2007_s18 = inlined_call_operand.hbm [shape: f32[8,128], index: 18, kind: output, shape index: {1}]   ;;  %s2008_s19 = inlined_call_operand.hbm [shape: f32[16,128], index: 19, kind: output, shape index: {2}]  }
   0x1   :  { %2009 = sst [smem:[#allocation31_spill]] %s1989_s0 }
   0x2   :  { %2010 = sst [smem:[#allocation32_spill]] %s1990_s1 }
   0x3   :  { %2011 = sst [smem:[#allocation33_spill]] %s1991_s2 }
   0x4   :  { %2012 = sst [smem:[#allocation34_spill]] %s1992_s3 }
   0x5   :  { %25 = vsyncpa [#allocation3], 0 }
   0x6   :  { %26 = vsyncpa [#allocation6], 0 }
   0x7   :  { %27 = vsyncpa [#allocation9], 0 }
   0x8   :  { %28 = vsyncpa [#allocation12], 0 }
   0x9   :  { %29 = vsyncpa [#allocation15], 0 }
   0xa   :  { %30 = vsyncpa [#allocation18], 0 }
   0xb   :  { %31 = vsyncpa [#allocation4], 0  ;;  %s2013_s20 = sld [smem:[#allocation32_spill]] }
  0x11   :  { %s49_s21 = sshll.u32 %s2013_s20, 4  ;;  %s50_s21 = int_to_ptr.hbm [resolvable:$true] %s49_s21 }
  0x12   :  { %32 = vsyncpa [#allocation21], 0  ;;  %s1466_s1 = smov [#allocation5]   ;;  %s72_s24 = sshll.u32 %s1993_s4, 4  ;;  %s73_s24 = int_to_ptr.hbm [resolvable:$true] %s72_s24 }
  0x13   :  { %s51_s22 = sshll.u32 %s1466_s1, 4  ;;  %s1467_s25 = smov [#allocation8]   ;;  %s52_s22 = int_to_ptr.vmem [resolvable:$true] %s51_s22 }
  0x14   :  { %54 = dma.hbm_to_vmem [thread:$0]  %s50_s21, 64, %s52_s22, [#allocation6]  }
  0x15   :  { %s74_s3 = sshll.u32 %s1467_s25, 4  ;;  %s1468_s26 = smov 128   ;;  %s75_s3 = int_to_ptr.vmem [resolvable:$true] %s74_s3 }
  0x16   :  { %s1469_s27 = smov 8   ;;  %s100_s0 = sshll.u32 %s1996_s7, 4  ;;  %s101_s0 = int_to_ptr.hbm [resolvable:$true] %s100_s0 }
  0x17   :  { %80 = dma.hbm_to_vmem [thread:$0]  %s73_s24, 256, %s75_s3, [#allocation9], %s1468_s26, %s1468_s26, %s1469_s27  }
  0x18   :  { %s1470_s30 = smov [#allocation11]   ;;  %s130_s1 = sshll.u32 %s2000_s11, 4  ;;  %s131_s1 = int_to_ptr.hbm [resolvable:$true] %s130_s1 }
  0x19   :  { %s102_s20 = sshll.u32 %s1470_s30, 4  ;;  %s1471_s22 = smov [#allocation14]   ;;  %s103_s20 = int_to_ptr.vmem [resolvable:$true] %s102_s20 }
  0x1a   :  { %108 = dma.hbm_to_vmem [thread:$0]  %s101_s0, 2048, %s103_s20, [#allocation12], %s1468_s26, %s1468_s26, %s1469_s27  }
  0x1b   :  { %s132_s2 = sshll.u32 %s1471_s22, 4  ;;  %s2014_s25 = sld [smem:[#allocation31_spill]]  ;;  %s133_s2 = int_to_ptr.vmem [resolvable:$true] %s132_s2 }
  0x1c   :  { %138 = dma.hbm_to_vmem [thread:$0]  %s131_s1, 2048, %s133_s2, [#allocation15], %s1468_s26, %s1468_s26, %s1469_s27  }
  0x1d   :  { %s2015_s11 = sld [smem:[#allocation34_spill]]  ;;  %s1472_s30 = smov [#allocation2]  }
  0x1e   :  { %s40_s4 = sshll.u32 %s1472_s30, 4  ;;  %s1473_s0 = smov [#allocation7]   ;;  %s41_s4 = int_to_ptr.vmem [resolvable:$true] %s40_s4 }
  0x1f   :  { %s64_s20 = sshll.u32 %s1473_s0, 4  ;;  %s85_s23 = sshll.u32 %s1994_s5, 4  ;;  %s65_s20 = int_to_ptr.vmem [resolvable:$true] %s64_s20  ;;  %s86_s23 = int_to_ptr.hbm [resolvable:$true] %s85_s23 }
  0x20   :  { %s115_s2 = sshll.u32 %s1998_s9, 4  ;;  %s145_s5 = sshll.u32 %s2002_s13, 4  ;;  %s116_s2 = int_to_ptr.hbm [resolvable:$true] %s115_s2  ;;  %s146_s5 = int_to_ptr.hbm [resolvable:$true] %s145_s5 }
  0x21   :  { %s38_s3 = sshll.u32 %s2014_s25, 4  ;;  %s1474_s25 = smov [#allocation10]   ;;  %s39_s3 = int_to_ptr.hbm [resolvable:$true] %s38_s3 }
  0x22   :  { %43 = dma.hbm_to_vmem [thread:$0]  %s39_s3, 64, %s41_s4, [#allocation3]  }
  0x23   :  { %s62_s29 = sshll.u32 %s2015_s11, 4  ;;  %s87_s7 = sshll.u32 %s1474_s25, 4  ;;  %s63_s29 = int_to_ptr.hbm [resolvable:$true] %s62_s29  ;;  %s88_s7 = int_to_ptr.vmem [resolvable:$true] %s87_s7 }
  0x24   :  { %67 = dma.hbm_to_vmem [thread:$0]  %s63_s29, 128, %s65_s20, [#allocation6]  }
  0x25   :  { %93 = dma.hbm_to_vmem [thread:$0]  %s86_s23, 2048, %s88_s7, [#allocation9], %s1468_s26, %s1468_s26, %s1469_s27  }
  0x26   :  { %s1475_s3 = smov [#allocation13]   ;;  %s160_s4 = sshll.u32 %s2004_s15, 4  ;;  %s161_s4 = int_to_ptr.hbm [resolvable:$true] %s160_s4 }
  0x27   :  { %s117_s28 = sshll.u32 %s1475_s3, 4  ;;  %s1476_s0 = smov [#allocation16]   ;;  %s118_s28 = int_to_ptr.vmem [resolvable:$true] %s117_s28 }
  0x28   :  { %123 = dma.hbm_to_vmem [thread:$0]  %s116_s2, 2048, %s118_s28, [#allocation12], %s1468_s26, %s1468_s26, %s1469_s27  }
  0x29   :  { %s147_s20 = sshll.u32 %s1476_s0, 4  ;;  %s1477_s21 = smov [#allocation17]   ;;  %s148_s20 = int_to_ptr.vmem [resolvable:$true] %s147_s20 }
  0x2a   :  { %153 = dma.hbm_to_vmem [thread:$0]  %s146_s5, 2048, %s148_s20, [#allocation15], %s1468_s26, %s1468_s26, %s1469_s27  }
  0x2b   :  { %s162_s13 = sshll.u32 %s1477_s21, 4  ;;  %s163_s13 = int_to_ptr.vmem [resolvable:$true] %s162_s13 }
  0x2c   :  { %168 = dma.hbm_to_vmem [thread:$0]  %s161_s4, 2048, %s163_s13, [#allocation18], %s1468_s26, %s1468_s26, %s1469_s27  }
  0x2d   :  { %1450 = dma.done.wait [#allocation3], 64  }
  0x2e   :  { %1451 = vsyncadd [#allocation3], 4294967232 }
  0x2f   :  { %1452 = dma.done.wait [#allocation6], 192  }
  0x30   :  { %1453 = vsyncadd [#allocation6], 4294967104 }
  0x31   :  { %1454 = dma.done.wait [#allocation9], 2304  }
  0x32   :  { %1455 = vsyncadd [#allocation9], 4294964992 }
  0x33   :  { %1456 = dma.done.wait [#allocation12], 4096  }
  0x34   :  { %1457 = vsyncadd [#allocation12], 4294963200 }
  0x35   :  { %1458 = dma.done.wait [#allocation15], 4096  }
  0x36   :  { %1459 = vsyncadd [#allocation15], 4294963200 }
  0x37   :  { %1460 = dma.done.wait [#allocation18], 2048  }
  0x38   :  { %1461 = vsyncadd [#allocation18], 4294965248  ;;  %v215_v0 = vld [vmem:[#allocation2] sm:$0xf]  ;;  %v1633_v1 = vld [vmem:[#allocation8 + $0x8] sm:$0xff]  ;;  %vm219_vm0 = vcmask 130048   ;;  %v707_v62 = vlaneseq }
  0x39   :  { %v1635_v2 = vld [vmem:[#allocation8] sm:$0xff]  ;;  %v216_v3 = vunpack.c.l.bf16 %v215_v0  ;;  %237 = vmatpush.msra.mxu0 %v1633_v1  ;;  %v217_v4 = vld [vmem:[#allocation5] sm:$0xf]  ;;  %300 = vmatpush.msra.mxu2 %v1633_v1  ;;  %v258_v5 = vld [vmem:[#allocation10 + $0x78] sm:$0xff]  ;;  %s2016_s23 = sld [smem:[#allocation33_spill]]  ;;  %vm378_vm1 = vcmask 64512  }
  0x3a   :  { %263 = vmatpush.msra.mxu3 %v258_v5  ;;  %v257_v6 = vld [vmem:[#allocation10 + $0x70] sm:$0xff]  ;;  %v218_v7 = vunpack.c.l.bf16 %v217_v4  ;;  %v256_v8 = vld [vmem:[#allocation10 + $0x68] sm:$0xff]  ;;  %v255_v9 = vld [vmem:[#allocation10 + $0x60] sm:$0xff]  ;;  %v708_v63 = vand.u32 127, %v707_v62  ;;  %vm711_vm3 = vcmask 1040384   ;;  %s1479_s3 = smov [#allocation19]  }
  0x3b   :  { %346 = vxpose.xlu0.b32.start.end [1/1] (short) (narrow) %v216_v3, 16  ;;  %238 = vmatpush.msra.mxu0 %v1635_v2  ;;  %v254_v10 = vld [vmem:[#allocation10 + $0x58] sm:$0xff]  ;;  %v253_v11 = vld [vmem:[#allocation10 + $0x50] sm:$0xff]  ;;  %v252_v12 = vld [vmem:[#allocation10 + $0x48] sm:$0xff]  ;;  %s1899_s28 = sshll.u32 %s1479_s3, 4  ;;  %s1013_s5 = sshll.u32 %s2006_s17, 4  ;;  %s1012_s28 = int_to_ptr.vmem [resolvable:$true] %s1899_s28  ;;  %s1014_s5 = int_to_ptr.hbm [resolvable:$true] %s1013_s5 }
  0x3c   :  { %1061 = vmatmul.msk.f32.vlgmr.msra.gmra.mxu0 %vm219_vm0, %v216_v3  ;;  %301 = vmatpush.msra.mxu2 %v1635_v2  ;;  %v251_v13 = vld [vmem:[#allocation10 + $0x40] sm:$0xff]  ;;  %v250_v14 = vld [vmem:[#allocation10 + $0x38] sm:$0xff]  ;;  %v249_v15 = vld [vmem:[#allocation10 + $0x30] sm:$0xff]  ;;  %vm709_vm2 = vcmp.lt.s32.totalorder %v708_v63, 32  ;;  %s1480_s29 = smov [#allocation20]   ;;  %s1024_s21 = sshll.u32 %s2007_s18, 4  ;;  %s1025_s21 = int_to_ptr.hbm [resolvable:$true] %s1024_s21 }
  0x3d   :  { %1062 = vmatmul.msk.f32.vlgmr.msra.gmra.mxu2 %vm219_vm0, %v218_v7  ;;  %264 = vmatpush.msra.mxu3 %v257_v6  ;;  %v248_v16 = vld [vmem:[#allocation10 + $0x28] sm:$0xff]  ;;  %v247_v17 = vld [vmem:[#allocation10 + $0x20] sm:$0xff]  ;;  %v246_v18 = vld [vmem:[#allocation10 + $0x18] sm:$0xff]  ;;  %s1022_s4 = sshll.u32 %s1480_s29, 4  ;;  %s1034_s22 = sshll.u32 %s2008_s19, 4  ;;  %s1023_s4 = int_to_ptr.vmem [resolvable:$true] %s1022_s4  ;;  %s1035_s22 = int_to_ptr.hbm [resolvable:$true] %s1034_s22 }
  0x3e   :  { %408 = vmatpush.msrb.mxu2 %v258_v5  ;;  %v245_v19 = vld [vmem:[#allocation10 + $0x10] sm:$0xff]  ;;  %v244_v20 = vld [vmem:[#allocation10 + $0x8] sm:$0xff]  ;;  %v243_v21 = vld [vmem:[#allocation10] sm:$0xff] }
  0x3f   :  { %265 = vmatpush.msra.mxu3 %v256_v8  ;;  %v1641_v22 = vld [vmem:[#allocation11 + $0x78] sm:$0xff]  ;;  %v1643_v23 = vld [vmem:[#allocation11 + $0x70] sm:$0xff]  ;;  %v1646_v24 = vld [vmem:[#allocation11 + $0x68] sm:$0xff] }
  0x40   :  { %409 = vmatpush.msrb.mxu2 %v257_v6  ;;  %v1649_v25 = vld [vmem:[#allocation11 + $0x60] sm:$0xff]  ;;  %v1652_v26 = vld [vmem:[#allocation11 + $0x58] sm:$0xff]  ;;  %v1655_v27 = vld [vmem:[#allocation11 + $0x50] sm:$0xff] }
  0x41   :  { %266 = vmatpush.msra.mxu3 %v255_v9  ;;  %v1658_v28 = vld [vmem:[#allocation11 + $0x48] sm:$0xff]  ;;  %v1661_v29 = vld [vmem:[#allocation11 + $0x40] sm:$0xff]  ;;  %v1664_v30 = vld [vmem:[#allocation11 + $0x38] sm:$0xff] }
  0x42   :  { %410 = vmatpush.msrb.mxu2 %v256_v8  ;;  %v1667_v31 = vld [vmem:[#allocation11 + $0x30] sm:$0xff]  ;;  %v1670_v32 = vld [vmem:[#allocation11 + $0x28] sm:$0xff]  ;;  %v1673_v33 = vld [vmem:[#allocation11 + $0x20] sm:$0xff] }
  0x43   :  { %267 = vmatpush.msra.mxu3 %v254_v10  ;;  %v1676_v34 = vld [vmem:[#allocation11 + $0x18] sm:$0xff]  ;;  %v1679_v35 = vld [vmem:[#allocation11 + $0x10] sm:$0xff]  ;;  %v1682_v36 = vld [vmem:[#allocation11 + $0x8] sm:$0xff] }
  0x44   :  { %411 = vmatpush.msrb.mxu2 %v255_v9  ;;  %v1686_v37 = vld [vmem:[#allocation11] sm:$0xff]  ;;  %v544_v38 = vld [vmem:[#allocation13 + $0x78] sm:$0xff]  ;;  %v543_v39 = vld [vmem:[#allocation13 + $0x70] sm:$0xff] }
  0x45   :  { %268 = vmatpush.msra.mxu3 %v253_v11  ;;  %546 = vmatpush.msra.mxu1 %v544_v38  ;;  %v542_v40 = vld [vmem:[#allocation13 + $0x68] sm:$0xff]  ;;  %v541_v41 = vld [vmem:[#allocation13 + $0x60] sm:$0xff]  ;;  %v540_v42 = vld [vmem:[#allocation13 + $0x58] sm:$0xff] }
  0x46   :  { %412 = vmatpush.msrb.mxu2 %v254_v10  ;;  %v539_v43 = vld [vmem:[#allocation13 + $0x50] sm:$0xff]  ;;  %v538_v44 = vld [vmem:[#allocation13 + $0x48] sm:$0xff]  ;;  %v537_v45 = vld [vmem:[#allocation13 + $0x40] sm:$0xff] }
  0x47   :  { %269 = vmatpush.msra.mxu3 %v252_v12  ;;  %547 = vmatpush.msra.mxu1 %v543_v39  ;;  %v536_v46 = vld [vmem:[#allocation13 + $0x38] sm:$0xff]  ;;  %v535_v47 = vld [vmem:[#allocation13 + $0x30] sm:$0xff]  ;;  %v534_v48 = vld [vmem:[#allocation13 + $0x28] sm:$0xff] }
  0x48   :  { %413 = vmatpush.msrb.mxu2 %v253_v11  ;;  %v533_v49 = vld [vmem:[#allocation13 + $0x20] sm:$0xff]  ;;  %v532_v50 = vld [vmem:[#allocation13 + $0x18] sm:$0xff]  ;;  %v531_v51 = vld [vmem:[#allocation13 + $0x10] sm:$0xff] }
  0x49   :  { %270 = vmatpush.msra.mxu3 %v251_v13  ;;  %548 = vmatpush.msra.mxu1 %v542_v40  ;;  %v1689_v52 = vld [vmem:[#allocation7] sm:$0xff]  ;;  %v529_v54 = vld [vmem:[#allocation13] sm:$0xff]  ;;  %v598_v63 = vld [vmem:[#allocation14 + $0x58] sm:$0xff] }
  0x4a   :  { %414 = vmatpush.msrb.mxu2 %v252_v12  ;;  %400 = vmatpush.msrb.mxu0 %v1689_v52  ;;  %v530_v53 = vld [vmem:[#allocation13 + $0x8] sm:$0xff]  ;;  %v1696_v57 = vld [vmem:[%s2016_s23] sm:$0x1] }
  0x4b   :  { %431 = vxpose.xlu0.b32.start.end [1/1] (short) (narrow) %v218_v7, 16  ;;  %271 = vmatpush.msra.mxu3 %v250_v14  ;;  %v1084_v0 = vld [vmem:[%s1995_s6] ss:$0 sm:$0xff]  ;;  %v677_v62 = vld [vmem:[#allocation17 + $0x68] sm:$0xff] }
  0x4c   :  { %415 = vmatpush.msrb.mxu2 %v251_v13  ;;  %549 = vmatpush.msra.mxu1 %v541_v41  ;;  %v1085_v6 = vld [vmem:[%s1997_s8] ss:$0 sm:$0xff] }
  0x4d   :  { %272 = vmatpush.msra.mxu3 %v249_v15  ;;  %484 = vmatpush.msra.mxu0 %v1689_v52  ;;  %v1736_v10 = vld [vmem:[%s1999_s10] sm:$0x1] }
  0x4e   :  { %416 = vmatpush.msrb.mxu2 %v250_v14  ;;  %550 = vmatpush.msra.mxu1 %v540_v42 }
  0x4f   :  { %273 = vmatpush.msra.mxu3 %v248_v16 }
  0x50   :  { %417 = vmatpush.msrb.mxu2 %v249_v15  ;;  %551 = vmatpush.msra.mxu1 %v539_v43 }
  0x51   :  { %274 = vmatpush.msra.mxu3 %v247_v17 }
  0x52   :  { %418 = vmatpush.msrb.mxu2 %v248_v16  ;;  %552 = vmatpush.msra.mxu1 %v538_v44 }
  0x53   :  { %275 = vmatpush.msra.mxu3 %v246_v18 }
  0x54   :  { %419 = vmatpush.msrb.mxu2 %v247_v17  ;;  %553 = vmatpush.msra.mxu1 %v537_v45 }
  0x55   :  { %276 = vmatpush.msra.mxu3 %v245_v19 }
  0x56   :  { %420 = vmatpush.msrb.mxu2 %v246_v18  ;;  %554 = vmatpush.msra.mxu1 %v536_v46 }
  0x57   :  { %277 = vmatpush.msra.mxu3 %v244_v20 }
  0x58   :  { %421 = vmatpush.msrb.mxu2 %v245_v19  ;;  %555 = vmatpush.msra.mxu1 %v535_v47 }
  0x59   :  { %278 = vmatpush.msra.mxu3 %v243_v21 }
  0x5a   :  { %422 = vmatpush.msrb.mxu2 %v244_v20  ;;  %556 = vmatpush.msra.mxu1 %v534_v48 }
  0x5b   :  { %326 = vmatpush.msrb.mxu3 %v1641_v22 }
  0x5c   :  { %423 = vmatpush.msrb.mxu2 %v243_v21  ;;  %557 = vmatpush.msra.mxu1 %v533_v49 }
  0x5d   :  { %327 = vmatpush.msrb.mxu3 %v1643_v23 }
  0x5e   :  { %558 = vmatpush.msra.mxu1 %v532_v50 }
  0x5f   :  { %328 = vmatpush.msrb.mxu3 %v1646_v24 }
  0x60   :  { %559 = vmatpush.msra.mxu1 %v531_v51 }
  0x61   :  { %329 = vmatpush.msrb.mxu3 %v1649_v25 }
  0x62   :  { %560 = vmatpush.msra.mxu1 %v530_v53 }
  0x63   :  { %330 = vmatpush.msrb.mxu3 %v1652_v26 }
  0x64   :  { %561 = vmatpush.msra.mxu1 %v529_v54 }
  0x65   :  { %331 = vmatpush.msrb.mxu3 %v1655_v27 }
  0x67   :  { %332 = vmatpush.msrb.mxu3 %v1658_v28 }
  0x69   :  { %333 = vmatpush.msrb.mxu3 %v1661_v29 }
  0x6b   :  { %334 = vmatpush.msrb.mxu3 %v1664_v30 }
  0x6d   :  { %335 = vmatpush.msrb.mxu3 %v1667_v31 }
  0x6f   :  { %336 = vmatpush.msrb.mxu3 %v1670_v32 }
  0x71   :  { %337 = vmatpush.msrb.mxu3 %v1673_v33 }
  0x73   :  { %338 = vmatpush.msrb.mxu3 %v1676_v34 }
  0x75   :  { %339 = vmatpush.msrb.mxu3 %v1679_v35 }
  0x77   :  { %340 = vmatpush.msrb.mxu3 %v1682_v36 }
  0x79   :  { %341 = vmatpush.msrb.mxu3 %v1686_v37 }
  0xb9   :  { %v240_v55 = vpop.f32.mrf.mxu0 }
  0xba   :  { %279 = vmatmul.f32.vlgmr.msra.gmra.mxu3 %v240_v55  ;;  %v641_v55 = vld [vmem:[#allocation16 + $0x70] sm:$0xff] }
  0xbb   :  { %566 = vmatpush.msra.mxu3 %v544_v38 }
  0xbd   :  { %567 = vmatpush.msra.mxu3 %v543_v39 }
  0xbf   :  { %568 = vmatpush.msra.mxu3 %v542_v40 }
  0xc0   :  { %v303_v56 = vpop.f32.mrf.mxu2 }
  0xc1   :  { %569 = vmatpush.msra.mxu3 %v541_v41 }
  0xc2   :  { %342 = vmatmul.f32.vlgmr.msrb.gmra.mxu3 %v303_v56  ;;  %v678_v56 = vld [vmem:[#allocation17 + $0x70] sm:$0xff] }
  0xc3   :  { %570 = vmatpush.msra.mxu3 %v540_v42 }
  0xc5   :  { %571 = vmatpush.msra.mxu3 %v539_v43 }
  0xc7   :  { %572 = vmatpush.msra.mxu3 %v538_v44 }
  0xc9   :  { %573 = vmatpush.msra.mxu3 %v537_v45 }
  0xcb   :  { %574 = vmatpush.msra.mxu3 %v536_v46 }
  0xcd   :  { %575 = vmatpush.msra.mxu3 %v535_v47 }
  0xcf   :  { %576 = vmatpush.msra.mxu3 %v534_v48 }
  0xd1   :  { %577 = vmatpush.msra.mxu3 %v533_v49  ;;  %v602_v49 = vld [vmem:[#allocation14 + $0x78] sm:$0xff] }
  0xd2   :  { %607 = vmatpush.msra.mxu2 %v602_v49  ;;  %v670_v49 = vld [vmem:[#allocation17 + $0x30] sm:$0xff] }
  0xd3   :  { %578 = vmatpush.msra.mxu3 %v532_v50  ;;  %v601_v50 = vld [vmem:[#allocation14 + $0x70] sm:$0xff] }
  0xd4   :  { %608 = vmatpush.msra.mxu2 %v601_v50 }
  0xd5   :  { %579 = vmatpush.msra.mxu3 %v531_v51  ;;  %v642_v51 = vld [vmem:[#allocation16 + $0x78] sm:$0xff] }
  0xd7   :  { %580 = vmatpush.msra.mxu3 %v530_v53  ;;  %v679_v53 = vld [vmem:[#allocation17 + $0x78] sm:$0xff] }
  0xd8   :  { %684 = vmatpush.msrb.mxu1 %v679_v53  ;;  %v632_v53 = vld [vmem:[#allocation16 + $0x28] sm:$0xff] }
  0xd9   :  { %581 = vmatpush.msra.mxu3 %v529_v54  ;;  %v600_v54 = vld [vmem:[#allocation14 + $0x68] sm:$0xff] }
  0xda   :  { %582 = vmatmul.f32.vlgmr.msra.gmra.mxu3 %v1696_v57  ;;  %609 = vmatpush.msra.mxu2 %v600_v54  ;;  %v669_v54 = vld [vmem:[#allocation17 + $0x28] sm:$0xff] }
  0xdb   :  { %685 = vmatpush.msrb.mxu1 %v678_v56  ;;  %v590_v56 = vld [vmem:[#allocation14 + $0x18] sm:$0xff] }
  0xdd   :  { %686 = vmatpush.msrb.mxu1 %v677_v62 }
  0xdf   :  { %v362_v58 = vpop.trf.xlu0 }
  0xe0   :  { %1063 = vmatmul.msk.f32.vlgmr.msrb.gmra.mxu0 %vm378_vm1, %v362_v58 }
  0xe1   :  { %492 = vmatpush.msrb.mxu0 %v1641_v22 }
  0xe3   :  { %493 = vmatpush.msrb.mxu0 %v1643_v23 }
  0xe5   :  { %494 = vmatpush.msrb.mxu0 %v1646_v24 }
  0xe7   :  { %v363_v59 = vpop.trf.xlu0  ;;  %495 = vmatpush.msrb.mxu0 %v1649_v25 }
  0xe8   :  { %1064 = vmatmul.msk.f32.gmra.mxu0 %vm378_vm1, %v363_v59  ;;  %v599_v59 = vld [vmem:[#allocation14 + $0x60] sm:$0xff] }
  0xe9   :  { %496 = vmatpush.msrb.mxu0 %v1652_v26  ;;  %610 = vmatpush.msra.mxu2 %v599_v59  ;;  %v668_v59 = vld [vmem:[#allocation17 + $0x20] sm:$0xff] }
  0xeb   :  { %497 = vmatpush.msrb.mxu0 %v1655_v27  ;;  %611 = vmatpush.msra.mxu2 %v598_v63 }
  0xed   :  { %498 = vmatpush.msrb.mxu0 %v1658_v28 }
  0xef   :  { %v447_v60 = vpop.trf.xlu0  ;;  %499 = vmatpush.msrb.mxu0 %v1661_v29 }
  0xf0   :  { %1065 = vmatmul.msk.f32.vlgmr.msra.gmra.mxu0 %vm378_vm1, %v447_v60  ;;  %v640_v60 = vld [vmem:[#allocation16 + $0x68] sm:$0xff] }
  0xf1   :  { %500 = vmatpush.msrb.mxu0 %v1664_v30 }
  0xf3   :  { %501 = vmatpush.msrb.mxu0 %v1667_v31 }
  0xf5   :  { %502 = vmatpush.msrb.mxu0 %v1670_v32 }
  0xf7   :  { %v448_v61 = vpop.trf.xlu0  ;;  %503 = vmatpush.msrb.mxu0 %v1673_v33 }
  0xf8   :  { %1066 = vmatmul.msk.f32.gmra.mxu0 %vm378_vm1, %v448_v61 }
  0xf9   :  { %504 = vmatpush.msrb.mxu0 %v1676_v34 }
  0xfb   :  { %505 = vmatpush.msrb.mxu0 %v1679_v35 }
  0xfd   :  { %506 = vmatpush.msrb.mxu0 %v1682_v36 }
  0xff   :  { %507 = vmatpush.msrb.mxu0 %v1686_v37 }
 0x101   :  { %644 = vmatpush.msra.mxu0 %v642_v51  ;;  %v591_v51 = vld [vmem:[#allocation14 + $0x20] sm:$0xff] }
 0x103   :  { %645 = vmatpush.msra.mxu0 %v641_v55 }
 0x105   :  { %646 = vmatpush.msra.mxu0 %v640_v60 }
 0x13d   :  { %v280_v3 = vpop.f32.mrf.mxu3 }
 0x13e   :  { %v1722_v4 = vadd.f32 %v1084_v0, %v280_v3 }
 0x140   :  { %v746_v5 = vsel %vm709_vm2, %v1722_v4, -1e+09 }
 0x141   :  { %747 = vmax.xlane.f32.xlu1 %v746_v5 }
 0x145   :  { %v343_v7 = vpop.f32.mrf.mxu3 }
 0x146   :  { %v1729_v8 = vadd.f32 %v1085_v6, %v343_v7  ;;  %v597_v7 = vld [vmem:[#allocation14 + $0x50] sm:$0xff] }
 0x147   :  { %612 = vmatpush.msra.mxu2 %v597_v7  ;;  %v630_v7 = vld [vmem:[#allocation16 + $0x18] sm:$0xff] }
 0x148   :  { %v776_v9 = vsel %vm709_vm2, %v1729_v8, -1e+09 }
 0x149   :  { %777 = vmax.xlane.f32.xlu2 %v776_v9 }
 0x15d   :  { %v402_v11 = vpop.f32.mrf.mxu0  ;;  %v583_v12 = vpop.f32.mrf.mxu3 }
 0x15e   :  { %424 = vmatmul.f32.vlgmr.msrb.gmra.mxu2 %v402_v11  ;;  %v584_v13 = vadd.f32 %v583_v12, %v1736_v10  ;;  %v675_v11 = vld [vmem:[#allocation17 + $0x58] sm:$0xff]  ;;  %v596_v12 = vld [vmem:[#allocation14 + $0x48] sm:$0xff] }
 0x15f   :  { %613 = vmatpush.msra.mxu2 %v596_v12 }
 0x160   :  { %v1739_v14 = vmul.f32 0.125, %v584_v13  ;;  %v637_v13 = vld [vmem:[#allocation16 + $0x50] sm:$0xff] }
 0x162   :  { %v710_v15 = vsel %vm709_vm2, %v1739_v14, -1e+09 }
 0x163   :  { %v712_v16 = vsel %vm711_vm3, %v710_v15, -inf }
 0x164   :  { %713 = vmax.xlane.f32.xlu1 %v712_v16  ;;  %v515_v16 = vrot.slane %v1689_v52, 4 }
 0x165   :  { %v405_v17 = vpop.f32.mrf.mxu0 }
 0x166   :  { %427 = vmatmul.f32.gmra.mxu2 %v405_v17 }
 0x16d   :  { %v486_v18 = vpop.f32.mrf.mxu0 }
 0x16e   :  { %508 = vmatmul.f32.vlgmr.msrb.gmra.mxu0 %v486_v18  ;;  %v595_v18 = vld [vmem:[#allocation14 + $0x40] sm:$0xff] }
 0x16f   :  { %614 = vmatpush.msra.mxu2 %v595_v18  ;;  %v665_v18 = vld [vmem:[#allocation17 + $0x8] sm:$0xff] }
 0x175   :  { %v489_v19 = vpop.f32.mrf.mxu0 }
 0x176   :  { %511 = vmatmul.f32.gmra.mxu0 %v489_v19  ;;  %v636_v19 = vld [vmem:[#allocation16 + $0x48] sm:$0xff] }
 0x1b4   :  { %v748_v20 = vpop.xlane.xlu1 %747 }
 0x1b5   :  { %v749_v21 = vsub.f32 %v746_v5, %v748_v20  ;;  %v676_v5 = vld [vmem:[#allocation17 + $0x60] sm:$0xff] }
 0x1b6   :  { %687 = vmatpush.msrb.mxu1 %v676_v5 }
 0x1b7   :  { %v750_v22 = vmul.f32 1.442695, %v749_v21 }
 0x1b8   :  { %688 = vmatpush.msrb.mxu1 %v675_v11  ;;  %v588_v11 = vld [vmem:[#allocation14 + $0x8] sm:$0xff] }
 0x1b9   :  { %1088 = vpow2.f32 %v750_v22  ;;  %v673_v22 = vld [vmem:[#allocation17 + $0x48] sm:$0xff] }
 0x1bc   :  { %v778_v23 = vpop.xlane.xlu2 %777 }
 0x1bd   :  { %v779_v24 = vsub.f32 %v776_v9, %v778_v23  ;;  %v638_v9 = vld [vmem:[#allocation16 + $0x58] sm:$0xff]  ;;  %v516_v23 = vadd.f32 %v515_v16, %v1689_v52  ;;  %v666_v16 = vld [vmem:[#allocation17 + $0x10] sm:$0xff] }
 0x1bf   :  { %v1089_v25 = vpop.eup %1088  ;;  %v780_v26 = vmul.f32 1.442695, %v779_v24 }
 0x1c0   :  { %v1744_v27 = vmul.f32 %v1089_v25, %v749_v21 }
 0x1c1   :  { %1090 = vpow2.f32 %v780_v26  ;;  %v635_v26 = vld [vmem:[#allocation16 + $0x40] sm:$0xff] }
 0x1c7   :  { %v1091_v28 = vpop.eup %1090 }
 0x1c8   :  { %v1746_v29 = vmul.f32 %v1091_v28, %v779_v24 }
 0x1d7   :  { %v714_v33 = vpop.xlane.xlu1 %713 }
 0x1d8   :  { %v715_v34 = vsub.f32 %v710_v15, %v714_v33  ;;  %v674_v15 = vld [vmem:[#allocation17 + $0x50] sm:$0xff] }
 0x1d9   :  { %689 = vmatpush.msrb.mxu1 %v674_v15  ;;  %v629_v15 = vld [vmem:[#allocation16 + $0x10] sm:$0xff] }
 0x1da   :  { %v716_v40 = vmul.f32 1.442695, %v715_v34 }
 0x1db   :  { %690 = vmatpush.msrb.mxu1 %v673_v22 }
 0x1dc   :  { %1092 = vpow2.f32 %v716_v40 }
 0x1e1   :  { %v425_v30 = vpop.f32.mrf.mxu2 }
 0x1e2   :  { %v1748_v31 = vadd.f32 %v1084_v0, %v425_v30  ;;  %v1093_v45 = vpop.eup %1092 }
 0x1e3   :  { %v721_v46 = vmul.f32 %v1093_v45, %v715_v34  ;;  %v718_v47 = vsel %vm711_vm3, %v1093_v45, 0.0  ;;  %v672_v34 = vld [vmem:[#allocation17 + $0x40] sm:$0xff]  ;;  %v671_v45 = vld [vmem:[#allocation17 + $0x38] sm:$0xff] }
 0x1e4   :  { %v806_v32 = vsel %vm709_vm2, %v1748_v31, -1e+09  ;;  %691 = vmatpush.msrb.mxu1 %v672_v34 }
 0x1e5   :  { %808 = vmax.xlane.f32.xlu2 %v806_v32  ;;  %v722_v48 = vsel %vm711_vm3, %v721_v46, 0.0 }
 0x1e6   :  { %692 = vmatpush.msrb.mxu1 %v671_v45 }
 0x1e8   :  { %693 = vmatpush.msrb.mxu1 %v670_v49 }
 0x1e9   :  { %v428_v35 = vpop.f32.mrf.mxu2 }
 0x1ea   :  { %v1752_v36 = vadd.f32 %v1084_v0, %v428_v35  ;;  %v639_v0 = vld [vmem:[#allocation16 + $0x60] sm:$0xff]  ;;  %v517_v35 = vrot.slane %v516_v23, 2  ;;  %694 = vmatpush.msrb.mxu1 %v669_v54 }
 0x1eb   :  { %v509_v37 = vpop.f32.mrf.mxu0  ;;  %647 = vmatpush.msra.mxu0 %v639_v0  ;;  %v589_v0 = vld [vmem:[#allocation14 + $0x10] sm:$0xff] }
 0x1ec   :  { %v1754_v38 = vadd.f32 %v1085_v6, %v509_v37  ;;  %v1758_v39 = vsel %vm709_vm2, %v1752_v36, -1e+09  ;;  %v593_v37 = vld [vmem:[#allocation14 + $0x30] sm:$0xff]  ;;  %v518_v46 = vadd.f32 %v517_v35, %v516_v23  ;;  %695 = vmatpush.msrb.mxu1 %v668_v59 }
 0x1ed   :  { %810 = vmax.xlane.f32.xlu1 %v1758_v39  ;;  %648 = vmatpush.msra.mxu0 %v638_v9  ;;  %v667_v9 = vld [vmem:[#allocation17 + $0x18] sm:$0xff] }
 0x1ee   :  { %v1763_v41 = vsel %vm709_vm2, %v1754_v38, -1e+09  ;;  %v519_v50 = vrot.slane %v518_v46, 1  ;;  %696 = vmatpush.msrb.mxu1 %v667_v9 }
 0x1ef   :  { %868 = vmax.xlane.f32.xlu2 %v1763_v41  ;;  %649 = vmatpush.msra.mxu0 %v637_v13 }
 0x1f0   :  { %v520_v60 = vadd.f32 %v519_v50, %v518_v46  ;;  %697 = vmatpush.msrb.mxu1 %v666_v16 }
 0x1f1   :  { %650 = vmatpush.msra.mxu0 %v636_v19  ;;  %v627_v19 = vld [vmem:[#allocation16] sm:$0xff] }
 0x1f2   :  { %698 = vmatpush.msrb.mxu1 %v665_v18 }
 0x1f3   :  { %v512_v42 = vpop.f32.mrf.mxu0  ;;  %651 = vmatpush.msra.mxu0 %v635_v26 }
 0x1f4   :  { %v1766_v43 = vadd.f32 %v1085_v6, %v512_v42  ;;  %v1478_v6 = vmov 8.0  }
 0x1f5   :  { %782 = vadd.xlane.f32.xlu1 %v1091_v28  ;;  %1094 = vrcp.f32 %v1478_v6 }
 0x1f6   :  { %v1770_v44 = vsel %vm709_vm2, %v1766_v43, -1e+09 }
 0x1f7   :  { %870 = vmax.xlane.f32.xlu0 %v1770_v44  ;;  %752 = vadd.xlane.f32.xlu2 %v1089_v25  ;;  %v594_v25 = vld [vmem:[#allocation14 + $0x38] sm:$0xff] }
 0x1f8   :  { %615 = vmatpush.msra.mxu2 %v594_v25 }
 0x1fa   :  { %616 = vmatpush.msra.mxu2 %v593_v37 }
 0x1fb   :  { %v1095_v20 = vpop.eup %1094 }
 0x1fc   :  { %v522_v28 = vmul.f32 8.0, %v1095_v20  ;;  %vm526_vm4 = vweird.f32 %v1095_v20 }
 0x1fd   :  { %719 = vadd.xlane.f32.xlu1 %v718_v47  ;;  %v633_v47 = vld [vmem:[#allocation16 + $0x30] sm:$0xff] }
 0x1fe   :  { %v523_v40 = vsub.f32 1.0, %v522_v28 }
 0x1ff   :  { %723 = vadd.xlane.f32.xlu2 %v722_v48 }
 0x200   :  { %v524_v48 = vmul.f32 %v1095_v20, %v523_v40 }
 0x202   :  { %v525_v55 = vadd.f32 %v1095_v20, %v524_v48 }
 0x204   :  { %v527_v63 = vsel %vm526_vm4, %v1095_v20, %v525_v55  ;;  %v664_v20 = vld [vmem:[#allocation17] sm:$0xff] }
 0x205   :  { %v528_v6 = vmul.f32 %v527_v63, %v520_v60  ;;  %699 = vmatpush.msrb.mxu1 %v664_v20 }
 0x207   :  { %562 = vmatmul.f32.vlgmr.msra.gmra.mxu1 %v528_v6 }
 0x20f   :  { %700 = vmatmul.f32.vlgmr.msrb.gmra.mxu1 %v1635_v2 }
 0x217   :  { %703 = vmatmul.f32.gmra.mxu1 %v1633_v1 }
 0x258   :  { %v809_v58 = vpop.xlane.xlu2 %808 }
 0x259   :  { %v1775_v61 = vsub.f32 %v806_v32, %v809_v58  ;;  %v631_v58 = vld [vmem:[#allocation16 + $0x20] sm:$0xff] }
 0x25b   :  { %v814_v3 = vmul.f32 1.442695, %v1775_v61 }
 0x25d   :  { %1096 = vpow2.f32 %v814_v3 }
 0x260   :  { %v811_v17 = vpop.xlane.xlu1 %810 }
 0x261   :  { %v1780_v21 = vsub.f32 %v1758_v39, %v811_v17  ;;  %v634_v39 = vld [vmem:[#allocation16 + $0x38] sm:$0xff]  ;;  %v587_v17 = vld [vmem:[#allocation14] sm:$0xff] }
 0x262   :  { %v869_v24 = vpop.xlane.xlu2 %868  ;;  %652 = vmatpush.msra.mxu0 %v634_v39 }
 0x263   :  { %v1783_v30 = vpop.eup %1096  ;;  %v816_v32 = vmul.f32 1.442695, %v1780_v21  ;;  %v1787_v33 = vsub.f32 %v1763_v41, %v869_v24  ;;  %v592_v41 = vld [vmem:[#allocation14 + $0x28] sm:$0xff] }
 0x264   :  { %818 = vadd.xlane.f32.xlu2 %v1783_v30  ;;  %617 = vmatpush.msra.mxu2 %v592_v41 }
 0x265   :  { %1098 = vpow2.f32 %v816_v32  ;;  %v874_v42 = vmul.f32 1.442695, %v1787_v33  ;;  %653 = vmatpush.msra.mxu0 %v633_v47 }
 0x266   :  { %618 = vmatpush.msra.mxu2 %v591_v51 }
 0x267   :  { %1100 = vpow2.f32 %v874_v42  ;;  %654 = vmatpush.msra.mxu0 %v632_v53 }
 0x268   :  { %619 = vmatpush.msra.mxu2 %v590_v56 }
 0x269   :  { %655 = vmatpush.msra.mxu0 %v631_v58 }
 0x26a   :  { %v871_v62 = vpop.xlane.xlu0 %870  ;;  %620 = vmatpush.msra.mxu2 %v589_v0  ;;  %v1804_v2 = vpop.xlane.xlu2 %752 }
 0x26b   :  { %v1099_v3 = vpop.eup %1098  ;;  %v873_v5 = vsub.f32 %v1770_v44, %v871_v62  ;;  %656 = vmatpush.msra.mxu0 %v630_v7  ;;  %v628_v44 = vld [vmem:[#allocation16 + $0x8] sm:$0xff]  ;;  %v768_v0 = vand.u32 2147483647, %v1804_v2  ;;  %v770_v6 = vand.u32 2147483648, %v1804_v2  ;;  %vm764_vm13 = vweird.f32 %v1804_v2 }
 0x26c   :  { %820 = vadd.xlane.f32.xlu1 %v1099_v3  ;;  %621 = vmatpush.msra.mxu2 %v588_v11  ;;  %v823_v23 = vmul.f32 %v1099_v3, %v1780_v21 }
 0x26d   :  { %v1101_v12 = vpop.eup %1100  ;;  %v876_v13 = vmul.f32 1.442695, %v873_v5  ;;  %657 = vmatpush.msra.mxu0 %v629_v15  ;;  %vm769_vm0 = vcmp.eq.f32.partialorder %v768_v0, 8.507059e+37 }
 0x26e   :  { %878 = vadd.xlane.f32.xlu2 %v1101_v12  ;;  %622 = vmatpush.msra.mxu2 %v587_v17 }
 0x26f   :  { %1102 = vpow2.f32 %v876_v13  ;;  %658 = vmatpush.msra.mxu0 %v628_v44  ;;  %623 = vmatmul.f32.vlgmr.msra.gmra.mxu2 %v1689_v52  ;;  %v822_v52 = vmul.f32 %v1783_v30, %v1775_v61 }
 0x271   :  { %659 = vmatpush.msra.mxu0 %v627_v19 }
 0x272   :  { %660 = vmatmul.f32.vlgmr.msra.gmra.mxu0 %v1696_v57  ;;  %v882_v57 = vmul.f32 %v1101_v12, %v1787_v33  ;;  %v724_v1 = vpop.xlane.xlu2 %723 }
 0x275   :  { %v1103_v22 = vpop.eup %1102 }
 0x276   :  { %785 = vadd.xlane.f32.xlu2 %v1746_v29  ;;  %880 = vadd.xlane.f32.xlu1 %v1103_v22  ;;  %v883_v24 = vmul.f32 %v1103_v22, %v873_v5  ;;  %v1802_v29 = vpop.xlane.xlu1 %782 }
 0x277   :  { %vm794_vm9 = vweird.f32 %v1802_v29  ;;  %v798_v59 = vand.u32 2147483647, %v1802_v29  ;;  %v800_v63 = vand.u32 2147483648, %v1802_v29 }
 0x279   :  { %vm799_vm14 = vcmp.eq.f32.partialorder %v798_v59, 8.507059e+37  ;;  %v801_v18 = vor.u32 1.1754944e-38, %v800_v63 }
 0x27e   :  { %755 = vadd.xlane.f32.xlu1 %v1744_v27  ;;  %826 = vadd.xlane.f32.xlu2 %v823_v23  ;;  %v720_v25 = vpop.xlane.xlu1 %719  ;;  %v771_v23 = vor.u32 1.1754944e-38, %v770_v6 }
 0x27f   :  { %1104 = vrcp.f32 %v720_v25  ;;  %v738_v35 = vand.u32 2147483648, %v720_v25  ;;  %vm732_vm6 = vweird.f32 %v720_v25  ;;  %v736_v37 = vand.u32 2147483647, %v720_v25 }
 0x280   :  { %1106 = vrcp.f32 %v1802_v29 }
 0x281   :  { %1108 = vrcp.f32 %v1804_v2  ;;  %v739_v42 = vor.u32 1.1754944e-38, %v738_v35  ;;  %vm737_vm8 = vcmp.eq.f32.partialorder %v736_v37, 8.507059e+37 }
 0x282   :  { %1110 = vlog2.f32 %v720_v25 }
 0x285   :  { %v1105_v21 = vpop.eup %1104 }
 0x286   :  { %824 = vadd.xlane.f32.xlu1 %v822_v52  ;;  %886 = vadd.xlane.f32.xlu2 %v883_v24  ;;  %v728_v27 = vmul.f32 %v1105_v21, %v720_v25  ;;  %v1808_v28 = vpop.eup %1106  ;;  %vm733_vm5 = vweird.f32 %v1105_v21 }
 0x287   :  { %v1810_v30 = vpop.eup %1108  ;;  %v790_v34 = vmul.f32 %v1808_v28, %v1802_v29  ;;  %vm734_vm7 = vmor %vm732_vm6, %vm733_vm5  ;;  %vm795_vm10 = vweird.f32 %v1808_v28 }
 0x288   :  { %v729_v26 = vsub.f32 1.0, %v728_v27  ;;  %v760_v39 = vmul.f32 %v1810_v30, %v1804_v2  ;;  %v1111_v49 = vpop.eup %1110  ;;  %vm765_vm11 = vweird.f32 %v1810_v30  ;;  %vm1846_vm12 = vmor %vm794_vm9, %vm795_vm10 }
 0x289   :  { %v791_v45 = vsub.f32 1.0, %v790_v34  ;;  %v726_v55 = vmul.f32 0.6931472, %v1111_v49  ;;  %vm1864_vm15 = vmor %vm764_vm13, %vm765_vm11  ;;  %v643_v49 = vld [vmem:[%s2003_s14] sm:$0x1] }
 0x28a   :  { %v730_v61 = vmul.f32 %v1105_v21, %v729_v26  ;;  %v761_v47 = vsub.f32 1.0, %v760_v39 }
 0x28b   :  { %v792_v50 = vmul.f32 %v1808_v28, %v791_v45 }
 0x28c   :  { %v731_v32 = vadd.f32 %v1105_v21, %v730_v61  ;;  %v762_v53 = vmul.f32 %v1810_v30, %v761_v47  ;;  %v563_v47 = vpop.f32.mrf.mxu1 }
 0x28d   :  { %v793_v58 = vadd.f32 %v1808_v28, %v792_v50 }
 0x28e   :  { %884 = vadd.xlane.f32.xlu1 %v882_v57  ;;  %v735_v40 = vsel %vm734_vm7, %v1105_v21, %v731_v32  ;;  %v763_v5 = vadd.f32 %v1810_v30, %v762_v53  ;;  %v564_v53 = vadd.f32 %v563_v47, %v1736_v10 }
 0x28f   :  { %v740_v41 = vsel %vm737_vm8, %v739_v42, %v735_v40  ;;  %v797_v16 = vsel %vm1846_vm12, %v1808_v28, %v793_v58 }
 0x290   :  { %v741_v51 = vmul.f32 %v740_v41, %v724_v1  ;;  %v767_v22 = vsel %vm1864_vm15, %v1810_v30, %v763_v5  ;;  %v802_v24 = vsel %vm799_vm14, %v801_v18, %v797_v16 }
 0x291   :  { %v772_v61 = vsel %vm769_vm0, %v771_v23, %v767_v22 }
 0x292   :  { %v742_v60 = vsub.f32 %v726_v55, %v741_v51 }
 0x294   :  { %v1859_v44 = vmul.f32 0.25503486, %v742_v60 }
 0x296   :  { %v927_v1 = vperm.slane %v1859_v44, 0 }
 0x2d7   :  { %v1812_v33 = vpop.xlane.xlu2 %818 }
 0x2d8   :  { %1112 = vrcp.f32 %v1812_v33  ;;  %vm837_vm4 = vweird.f32 %v1812_v33  ;;  %v843_v34 = vand.u32 2147483648, %v1812_v33  ;;  %v841_v6 = vand.u32 2147483647, %v1812_v33 }
 0x2da   :  { %vm842_vm13 = vcmp.eq.f32.partialorder %v841_v6, 8.507059e+37  ;;  %v1954_v6 = vpop.f32.mrf.mxu1 }
 0x2de   :  { %v1828_v54 = vpop.eup %1112 }
 0x2df   :  { %v1819_v46 = vpop.xlane.xlu1 %820  ;;  %v833_v3 = vmul.f32 %v1828_v54, %v1812_v33  ;;  %vm838_vm5 = vweird.f32 %v1828_v54 }
 0x2e0   :  { %1114 = vrcp.f32 %v1819_v46  ;;  %vm852_vm2 = vweird.f32 %v1819_v46  ;;  %v856_v26 = vand.u32 2147483647, %v1819_v46  ;;  %vm1924_vm9 = vmor %vm837_vm4, %vm838_vm5 }
 0x2e1   :  { %v1822_v48 = vpop.xlane.xlu2 %878  ;;  %1116 = vlog2.f32 %v1802_v29  ;;  %v834_v52 = vsub.f32 1.0, %v833_v3  ;;  %v858_v29 = vand.u32 2147483648, %v1819_v46 }
 0x2e2   :  { %1118 = vlog2.f32 %v1804_v2  ;;  %vm857_vm6 = vcmp.eq.f32.partialorder %v856_v26, 8.507059e+37  ;;  %vm897_vm14 = vweird.f32 %v1822_v48 }
 0x2e3   :  { %1120 = vrcp.f32 %v1822_v48  ;;  %v835_v32 = vmul.f32 %v1828_v54, %v834_v52  ;;  %v859_v40 = vor.u32 1.1754944e-38, %v858_v29 }
 0x2e5   :  { %v836_v60 = vadd.f32 %v1828_v54, %v835_v32 }
 0x2e6   :  { %v1831_v56 = vpop.eup %1114 }
 0x2e7   :  { %v848_v62 = vmul.f32 %v1831_v56, %v1819_v46  ;;  %v1117_v7 = vpop.eup %1116  ;;  %vm853_vm1 = vweird.f32 %v1831_v56  ;;  %v840_v22 = vsel %vm1924_vm9, %v1828_v54, %v836_v60  ;;  %v901_v54 = vand.u32 2147483647, %v1822_v48 }
 0x2e8   :  { %v1119_v15 = vpop.eup %1118  ;;  %v788_v2 = vmul.f32 0.6931472, %v1117_v7  ;;  %vm1882_vm3 = vmor %vm852_vm2, %vm853_vm1 }
 0x2e9   :  { %v786_v9 = vpop.xlane.xlu2 %785  ;;  %v1850_v12 = vpop.xlane.xlu1 %880  ;;  %v849_v13 = vsub.f32 1.0, %v848_v62  ;;  %v758_v27 = vmul.f32 0.6931472, %v1119_v15  ;;  %vm902_vm0 = vcmp.eq.f32.partialorder %v901_v54, 8.507059e+37  ;;  %v1086_v54 = vld [vmem:[%s2005_s16] ss:$0 sm:$0xff] }
 0x2ea   :  { %1122 = vrcp.f32 %v1850_v12  ;;  %v1857_v17 = vpop.eup %1120  ;;  %v803_v21 = vmul.f32 %v802_v24, %v786_v9  ;;  %v918_v59 = vand.u32 2147483648, %v1850_v12  ;;  %v916_v63 = vand.u32 2147483647, %v1850_v12  ;;  %s1481_s16 = smov [#allocation22]  }
 0x2eb   :  { %v850_v19 = vmul.f32 %v1831_v56, %v849_v13  ;;  %v893_v25 = vmul.f32 %v1857_v17, %v1822_v48  ;;  %1124 = vlog2.f32 %v1819_v46  ;;  %vm912_vm8 = vweird.f32 %v1850_v12  ;;  %s1032_s18 = sshll.u32 %s1481_s16, 4  ;;  %s1033_s18 = int_to_ptr.vmem [resolvable:$true] %s1032_s18 }
 0x2ec   :  { %v804_v45 = vsub.f32 %v788_v2, %v803_v21  ;;  %1126 = vlog2.f32 %v1850_v12  ;;  %v919_v18 = vor.u32 1.1754944e-38, %v918_v59  ;;  %vm917_vm11 = vcmp.eq.f32.partialorder %v916_v63, 8.507059e+37 }
 0x2ed   :  { %v851_v57 = vadd.f32 %v1831_v56, %v850_v19  ;;  %v894_v41 = vsub.f32 1.0, %v893_v25  ;;  %1128 = vlog2.f32 %v1812_v33  ;;  %vm898_vm12 = vweird.f32 %v1857_v17 }
 0x2ee   :  { %v1911_v5 = vmul.f32 0.25503486, %v804_v45  ;;  %1130 = vlog2.f32 %v1822_v48  ;;  %v903_v21 = vand.u32 2147483648, %v1822_v48  ;;  %vm899_vm15 = vmor %vm897_vm14, %vm898_vm12 }
 0x2ef   :  { %v855_v39 = vsel %vm1882_vm3, %v1831_v56, %v851_v57  ;;  %v661_v50 = vpop.f32.mrf.mxu0  ;;  %v895_v7 = vmul.f32 %v1857_v17, %v894_v41 }
 0x2f0   :  { %v1879_v28 = vpop.eup %1122  ;;  %v662_v55 = vadd.f32 %v661_v50, %v643_v49  ;;  %v860_v56 = vsel %vm857_vm6, %v859_v40, %v855_v39 }
 0x2f1   :  { %v908_v35 = vmul.f32 %v1879_v28, %v1850_v12  ;;  %v827_v37 = vpop.xlane.xlu2 %826  ;;  %v756_v42 = vpop.xlane.xlu1 %755  ;;  %vm913_vm7 = vweird.f32 %v1879_v28  ;;  %v844_v12 = vor.u32 1.1754944e-38, %v843_v34  ;;  %v896_v57 = vadd.f32 %v1857_v17, %v895_v7 }
 0x2f2   :  { %v773_v46 = vmul.f32 %v772_v61, %v756_v42  ;;  %v1004_v0 = vadd.f32 %v662_v55, %v564_v53  ;;  %v1125_v3 = vpop.eup %1124  ;;  %v861_v9 = vmul.f32 %v860_v56, %v827_v37  ;;  %vm914_vm10 = vmor %vm912_vm8, %vm913_vm7  ;;  %v904_v37 = vor.u32 1.1754944e-38, %v903_v21 }
 0x2f3   :  { %v909_v51 = vsub.f32 1.0, %v908_v35  ;;  %v1127_v15 = vpop.eup %1126  ;;  %v831_v19 = vmul.f32 0.6931472, %v1125_v3  ;;  %v845_v61 = vsel %vm842_vm13, %v844_v12, %v840_v22  ;;  %v900_v32 = vsel %vm899_vm15, %v1857_v17, %v896_v57 }
 0x2f4   :  { %v774_v58 = vsub.f32 %v758_v27, %v773_v46  ;;  %1005 = vst [vmem:[#allocation19] sm:$0x1] %v1004_v0  ;;  %v891_v25 = vmul.f32 0.6931472, %v1127_v15  ;;  %v1129_v27 = vpop.eup %1128  ;;  %v905_v42 = vsel %vm902_vm0, %v904_v37, %v900_v32 }
 0x2f5   :  { %v910_v62 = vmul.f32 %v1879_v28, %v909_v51  ;;  %1016 = dma.vmem_to_hbm [thread:$0]  %s1012_s28, 16, %s1014_s5, [#allocation4]   ;;  %v863_v29 = vsub.f32 %v831_v19, %v861_v9  ;;  %v829_v39 = vmul.f32 0.6931472, %v1129_v27  ;;  %v982_v19 = vperm.slane %v1739_v14, 0 }
 0x2f6   :  { %v1913_v10 = vmul.f32 0.25503486, %v774_v58 }
 0x2f7   :  { %v911_v11 = vadd.f32 %v1879_v28, %v910_v62  ;;  %v865_v34 = vmul.f32 0.25503486, %v863_v29 }
 0x2f8   :  { %v926_v16 = vadd.f32 %v1911_v5, %v1913_v10 }
 0x2f9   :  { %v887_v20 = vpop.xlane.xlu2 %886  ;;  %v915_v33 = vsel %vm914_vm10, %v1879_v28, %v911_v11  ;;  %v825_v23 = vpop.xlane.xlu1 %824 }
 0x2fa   :  { %v928_v52 = vadd.f32 %v927_v1, %v926_v16  ;;  %v920_v24 = vsel %vm917_vm11, %v919_v18, %v915_v33  ;;  %v1131_v28 = vpop.eup %1130  ;;  %v846_v30 = vmul.f32 %v845_v61, %v825_v23  ;;  %v1087_v33 = vld [vmem:[%s2001_s12] ss:$0 sm:$0xff] }
 0x2fb   :  { %v921_v2 = vmul.f32 %v920_v24, %v887_v20  ;;  %v889_v47 = vmul.f32 0.6931472, %v1131_v28  ;;  %v704_v28 = vpop.f32.mrf.mxu1 }
 0x2fc   :  { %1132 = vrcp.f32 %v928_v52  ;;  %v862_v41 = vsub.f32 %v829_v39, %v846_v30  ;;  %v940_v53 = vand.u32 2147483648, %v928_v52  ;;  %v938_v58 = vand.u32 2147483647, %v928_v52 }
 0x2fd   :  { %v923_v26 = vsub.f32 %v891_v25, %v921_v2  ;;  %vm934_vm2 = vweird.f32 %v928_v52  ;;  %v705_v39 = vadd.f32 %v1086_v54, %v704_v28 }
 0x2fe   :  { %v1945_v55 = vmul.f32 0.25503486, %v862_v41  ;;  %v941_v63 = vor.u32 1.1754944e-38, %v940_v53  ;;  %vm939_vm4 = vcmp.eq.f32.partialorder %v938_v58, 8.507059e+37 }
 0x2ff   :  { %v925_v35 = vmul.f32 0.25503486, %v923_v26 }
 0x301   :  { %v945_v40 = vadd.f32 %v925_v35, %v865_v34  ;;  %v885_v45 = vpop.xlane.xlu1 %884 }
 0x302   :  { %v1133_v46 = vpop.eup %1132  ;;  %v906_v48 = vmul.f32 %v905_v42, %v885_v45 }
 0x303   :  { %v930_v49 = vmul.f32 %v1133_v46, %v928_v52  ;;  %1134 = vrcp.f32 %v945_v40  ;;  %vm935_vm1 = vweird.f32 %v1133_v46  ;;  %v972_v15 = vand.u32 2147483648, %v945_v40 }
 0x304   :  { %v922_v50 = vsub.f32 %v889_v47, %v906_v48  ;;  %vm936_vm3 = vmor %vm934_vm2, %vm935_vm1  ;;  %v970_v18 = vand.u32 2147483647, %v945_v40  ;;  %vm966_vm6 = vweird.f32 %v945_v40 }
 0x305   :  { %v931_v51 = vsub.f32 1.0, %v930_v49  ;;  %v973_v52 = vor.u32 1.1754944e-38, %v972_v15 }
 0x306   :  { %v1947_v17 = vmul.f32 0.25503486, %v922_v50  ;;  %vm971_vm8 = vcmp.eq.f32.partialorder %v970_v18, 8.507059e+37  ;;  %v702_v50 = vadd.f32 %v1086_v54, %v1954_v6 }
 0x307   :  { %v932_v56 = vmul.f32 %v1133_v46, %v931_v51 }
 0x308   :  { %v1951_v59 = vadd.f32 %v1947_v17, %v1945_v55 }
 0x309   :  { %v1135_v60 = vpop.eup %1134  ;;  %v933_v62 = vadd.f32 %v1133_v46, %v932_v56 }
 0x30a   :  { %v962_v0 = vmul.f32 %v1135_v60, %v945_v40  ;;  %1136 = vrcp.f32 %v1951_v59  ;;  %vm967_vm5 = vweird.f32 %v1135_v60  ;;  %v955_v26 = vand.u32 2147483647, %v1951_v59 }
 0x30b   :  { %v937_v3 = vsel %vm936_vm3, %v1133_v46, %v933_v62  ;;  %vm968_vm7 = vmor %vm966_vm6, %vm967_vm5  ;;  %vm951_vm10 = vweird.f32 %v1951_v59 }
 0x30c   :  { %v942_v7 = vsel %vm939_vm4, %v941_v63, %v937_v3  ;;  %v963_v9 = vsub.f32 1.0, %v962_v0  ;;  %vm956_vm12 = vcmp.eq.f32.partialorder %v955_v26, 8.507059e+37 }
 0x30d   :  { %v976_v11 = vmul.f32 %v942_v7, %v1913_v10  ;;  %v978_v13 = vmul.f32 %v942_v7, %v1911_v5  ;;  %v981_v12 = vmul.f32 %v942_v7, %v927_v1  ;;  %v624_v5 = vpop.f32.mrf.mxu2 }
 0x30e   :  { %v964_v16 = vmul.f32 %v1135_v60, %v963_v9  ;;  %v625_v29 = vadd.f32 %v1087_v33, %v624_v5 }
 0x30f   :  { %v977_v20 = vmul.f32 %v976_v11, %v1722_v4  ;;  %v979_v22 = vmul.f32 %v978_v13, %v1729_v8  ;;  %v983_v1 = vmul.f32 %v982_v19, %v981_v12  ;;  %v957_v8 = vand.u32 2147483648, %v1951_v59 }
 0x310   :  { %v1137_v10 = vpop.eup %1136  ;;  %v965_v23 = vadd.f32 %v1135_v60, %v964_v16 }
 0x311   :  { %v947_v24 = vmul.f32 %v1137_v10, %v1951_v59  ;;  %v980_v44 = vadd.f32 %v979_v22, %v977_v20  ;;  %vm952_vm9 = vweird.f32 %v1137_v10  ;;  %v958_v37 = vor.u32 1.1754944e-38, %v957_v8 }
 0x312   :  { %v969_v57 = vsel %vm968_vm7, %v1135_v60, %v965_v23  ;;  %vm953_vm11 = vmor %vm951_vm10, %vm952_vm9 }
 0x313   :  { %v974_v14 = vsel %vm971_vm8, %v973_v52, %v969_v57  ;;  %v948_v4 = vsub.f32 1.0, %v947_v24  ;;  %v984_v25 = vadd.f32 %v983_v1, %v980_v44 }
 0x314   :  { %v989_v2 = vmul.f32 %v974_v14, %v865_v34  ;;  %v993_v21 = vmul.f32 %v974_v14, %v925_v35 }
 0x315   :  { %v949_v27 = vmul.f32 %v1137_v10, %v948_v4  ;;  %v985_v61 = vmul.f32 0.33333334, %v984_v25 }
 0x316   :  { %v991_v30 = vmul.f32 %v989_v2, %v1752_v36  ;;  %v995_v32 = vmul.f32 %v993_v21, %v1766_v43 }
 0x317   :  { %v950_v34 = vadd.f32 %v1137_v10, %v949_v27  ;;  %v986_v35 = vadd.f32 %v985_v61, %v625_v29 }
 0x318   :  { %v997_v40 = vadd.f32 %v995_v32, %v991_v30 }
 0x319   :  { %v954_v42 = vsel %vm953_vm11, %v1137_v10, %v950_v34  ;;  %987 = vst [vmem:[#allocation20] sm:$0xff] %v986_v35 }
 0x31a   :  { %v959_v45 = vsel %vm956_vm12, %v958_v37, %v954_v42  ;;  %v999_v46 = vmul.f32 0.5, %v997_v40  ;;  %1027 = dma.vmem_to_hbm [thread:$0]  %s1023_s4, 128, %s1025_s21, [#allocation21]  }
 0x31b   :  { %v988_v36 = vmul.f32 %v959_v45, %v1945_v55  ;;  %v992_v43 = vmul.f32 %v959_v45, %v1947_v17 }
 0x31c   :  { %v1001_v41 = vadd.f32 %v999_v46, %v705_v39 }
 0x31d   :  { %v990_v47 = vmul.f32 %v988_v36, %v1748_v31  ;;  %v994_v48 = vmul.f32 %v992_v43, %v1754_v38 }
 0x31e   :  { %1003 = vst [vmem:[#allocation22 + $0x8] sm:$0xff] %v1001_v41 }
 0x31f   :  { %v996_v49 = vadd.f32 %v994_v48, %v990_v47 }
 0x321   :  { %v998_v51 = vmul.f32 0.5, %v996_v49 }
 0x323   :  { %v1000_v53 = vadd.f32 %v998_v51, %v702_v50 }
 0x325   :  { %1002 = vst [vmem:[#allocation22] sm:$0xff] %v1000_v53 }
 0x326   :  { %1040 = dma.vmem_to_hbm [thread:$0]  %s1033_s18, 256, %s1035_s22, [#allocation21], %s1468_s26, %s1468_s26, %s1469_s27  }
 0x327   :  { %1462 = dma.done.wait [#allocation4], 16  }
 0x328   :  { %1463 = vsyncadd [#allocation4], 4294967280 }
 0x329   :  { %1464 = dma.done.wait [#allocation21], 384  }
 0x32a   :  { %1465 = vsyncadd [#allocation21], 4294966912 }
 0x32b   :  { %1053 = vsyncpa [#allocation3], 1 }
 0x32c   :  { %1054 = vsyncpa [#allocation6], 1 }
 0x32d   :  { %1055 = vsyncpa [#allocation9], 1 }
 0x32e   :  { %1056 = vsyncpa [#allocation12], 1 }
 0x32f   :  { %1057 = vsyncpa [#allocation15], 1 }
 0x330   :  { %1058 = vsyncpa [#allocation18], 1 }
 0x331   :  { %1059 = vsyncpa [#allocation4], 1 }
 0x332   :  { %1060 = vsyncpa [#allocation21], 1 }

</bundles_post_ra>
